<compile_context>
chip_gen: v7x
topology: tpu7x:2x2x1
jax: 0.10.0
libtpu: 0.0.40
codegen_flags: <defaults>
</compile_context>

<pallas_src>
import functools

import jax
import jax.numpy as jnp
from jax.experimental import pallas as pl
from jax.experimental.pallas import tpu as pltpu


def _round_up(x, m):
    return (x + m - 1) // m * m


def _enc_block(msg_f32, ew1_ref, eb1_ref, ew2_ref, eb2_ref, cdt):
    """Linear(d->h) -> ReLU -> Linear(h->d); bf16 MXU inputs, f32 accumulation."""
    hid = jnp.dot(msg_f32.astype(cdt), ew1_ref[...],
                  preferred_element_type=jnp.float32)
    hid = jnp.maximum(hid + eb1_ref[...], 0.0)
    enc = jnp.dot(hid.astype(cdt), ew2_ref[...],
                  preferred_element_type=jnp.float32)
    return enc + eb2_ref[...]


def _agg_kernel_nocat(w_ref, d_vec_ref, pre_vec_ref,
                      ew1_ref, eb1_ref, ew2_ref, eb2_ref,
                      out_ref, *, compute_dtype):
    enc = _enc_block(d_vec_ref[...], ew1_ref, eb1_ref, ew2_ref, eb2_ref,
                     compute_dtype)
    out_ref[...] = jnp.maximum(pre_vec_ref[...], enc * w_ref[0]).astype(out_ref.dtype)


def _agg_kernel_cat(w_ref, d_vec_ref, pre_vec_ref, cur_d_vec_ref,
                    mw1_cur_ref, mw1_d_ref, mb1_ref, mw2_ref, mb2_ref,
                    ew1_ref, eb1_ref, ew2_ref, eb2_ref,
                    out_ref, *, compute_dtype):
    cdt = compute_dtype
    d_vec = d_vec_ref[...].astype(cdt)
    cur = cur_d_vec_ref[...].astype(cdt)
    # Split matmul == Linear(2d->h) applied to concat(cur_d_vec, d_vec) without
    # materializing the [TM, 2d] concat buffer (no extra VMEM copy / XLU work).
    hid = (jnp.dot(cur, mw1_cur_ref[...], preferred_element_type=jnp.float32) +
           jnp.dot(d_vec, mw1_d_ref[...], preferred_element_type=jnp.float32))
    hid = jnp.maximum(hid + mb1_ref[...], 0.0)
    msg = jnp.dot(hid.astype(cdt), mw2_ref[...],
                  preferred_element_type=jnp.float32) + mb2_ref[...]
    enc = _enc_block(msg, ew1_ref, eb1_ref, ew2_ref, eb2_ref, cdt)
    out_ref[...] = jnp.maximum(pre_vec_ref[...], enc * w_ref[0]).astype(out_ref.dtype)


def aggregate_maxpool_enc(d_vec, pre_vec, cur_d_vec, params,
                          w=1.0, cat_msg=False, *,
                          tm=256, compute_dtype=jnp.bfloat16):
    """Pallas implementation of AggregateMaxPoolEnc.forward.

    d_vec, pre_vec, cur_d_vec : [M, d] float32
    params : dict with msg_w1 (2d,h), msg_b1 (1,h), msg_w2 (h,d), msg_b2 (1,d),
             enc_w1 (d,h),  enc_b1 (1,h), enc_w2 (h,d),  enc_b2 (1,d)
    """
    # Mirror the PyTorch signature where cat_msg arrives as a 1-element list.
    if isinstance(cat_msg, (list, tuple)):
        cat_msg = cat_msg[0]
    cat_msg = bool(cat_msg)

    M, d = d_vec.shape
    h = params["enc_w1"].shape[1]
    f32 = jnp.float32
    cdt = compute_dtype

    # Row tile: multiple of 8 (sublane granularity), capped at `tm`; pad the
    # row dimension so the grid tiles exactly (padded rows are sliced off).
    TM = min(tm, _round_up(M, 8))
    Mp = _round_up(M, TM)
    grid = (Mp // TM,)

    def pad_rows(x):
        x = x.astype(f32)
        return jnp.pad(x, ((0, Mp - M), (0, 0))) if Mp != M else x

    d_p, pre_p = pad_rows(d_vec), pad_rows(pre_vec)
    w_scalar = jnp.asarray([w], dtype=f32)

    # index_maps receive (grid_i, *scalar_prefetch_refs).
    act_spec = pl.BlockSpec((TM, d), lambda i, w_s: (i, 0))

    def resident(shape):
        # Same block every grid step -> DMA'd once, stays VMEM-resident.
        return pl.BlockSpec(shape, lambda i, w_s: (0, 0))

    ew1 = params["enc_w1"].astype(cdt)
    eb1 = params["enc_b1"].astype(f32)
    ew2 = params["enc_w2"].astype(cdt)
    eb2 = params["enc_b2"].astype(f32)

    if cat_msg:
        cur_p = pad_rows(cur_d_vec)
        mw1 = params["msg_w1"].astype(cdt)
        mw1_cur, mw1_d = mw1[:d], mw1[d:]          # split concat-matmul halves
        mb1 = params["msg_b1"].astype(f32)
        mw2 = params["msg_w2"].astype(cdt)
        mb2 = params["msg_b2"].astype(f32)
        kernel = functools.partial(_agg_kernel_cat, compute_dtype=cdt)
        in_specs = [act_spec, act_spec, act_spec,
                    resident((d, h)), resident((d, h)), resident((1, h)),
                    resident((h, d)), resident((1, d)),
                    resident((d, h)), resident((1, h)),
                    resident((h, d)), resident((1, d))]
        args = (d_p, pre_p, cur_p,
                mw1_cur, mw1_d, mb1, mw2, mb2, ew1, eb1, ew2, eb2)
        flops = 10 * Mp * d * h        # 2*Mp*(2dh + hd) + 2*Mp*(dh + hd)
    else:
        # Common path: no cur_d_vec / msg-MLP operands at all (no dead DMA).
        kernel = functools.partial(_agg_kernel_nocat, compute_dtype=cdt)
        in_specs = [act_spec, act_spec,
                    resident((d, h)), resident((1, h)),
                    resident((h, d)), resident((1, d))]
        args = (d_p, pre_p, ew1, eb1, ew2, eb2)
        flops = 4 * Mp * d * h         # 2*Mp*(dh + hd)

    bytes_accessed = (sum(int(a.size) * a.dtype.itemsize for a in args)
                      + Mp * d * 4 + 4)

    out = pl.pallas_call(
        kernel,
        out_shape=jax.ShapeDtypeStruct((Mp, d), f32),
        grid_spec=pltpu.PrefetchScalarGridSpec(
            num_scalar_prefetch=1,
            grid=grid,
            in_specs=in_specs,
            out_specs=pl.BlockSpec((TM, d), lambda i, w_s: (i, 0)),
        ),
        compiler_params=pltpu.CompilerParams(
            dimension_semantics=("parallel",),     # v7x: shard rows over 2 TCs
        ),
        cost_estimate=pl.CostEstimate(flops=int(flops), transcendentals=0,
                                      bytes_accessed=int(bytes_accessed)),
    )(w_scalar, *args)

    return out[:M] if Mp != M else out


def _reference(d_vec, pre_vec, cur_d_vec, params, w=1.0, cat_msg=False,
               compute_dtype=jnp.bfloat16):
    """Pure-JAX reference mirroring the PyTorch forward (same bf16 matmul inputs)."""
    cdt = compute_dtype

    def lin(x, W, b):
        return jnp.dot(x.astype(cdt), W.astype(cdt),
                       preferred_element_type=jnp.float32) + b

    if cat_msg:
        x = jnp.concatenate([cur_d_vec, d_vec], axis=1)
        hid = jnp.maximum(lin(x, params["msg_w1"], params["msg_b1"]), 0.0)
        msg = lin(hid, params["msg_w2"], params["msg_b2"])
    else:
        msg = d_vec
    hid = jnp.maximum(lin(msg, params["enc_w1"], params["enc_b1"]), 0.0)
    enc = lin(hid, params["enc_w2"], params["enc_b2"]) * w
    return jnp.maximum(pre_vec, enc)


def _init_params(key, d, h):
    """Deterministic init, PyTorch-nn.Linear-style uniform(-1/sqrt(fan_in), ...)."""
    ks = jax.random.split(key, 4)

    def lin(k, fan_in, fan_out):
        bound = 1.0 / jnp.sqrt(fan_in)
        kw, kb = jax.random.split(k)
        wgt = jax.random.uniform(kw, (fan_in, fan_out), jnp.float32, -bound, bound)
        b = jax.random.uniform(kb, (1, fan_out), jnp.float32, -bound, bound)
        return wgt, b

    msg_w1, msg_b1 = lin(ks[0], 2 * d, h)
    msg_w2, msg_b2 = lin(ks[1], h, d)
    enc_w1, enc_b1 = lin(ks[2], d, h)
    enc_w2, enc_b2 = lin(ks[3], h, d)
    return dict(msg_w1=msg_w1, msg_b1=msg_b1, msg_w2=msg_w2, msg_b2=msg_b2,
                enc_w1=enc_w1, enc_b1=enc_b1, enc_w2=enc_w2, enc_b2=enc_b2)


if __name__ == "__main__":
    # Small shapes consistent with the module (vectors of dim d, hidden h).
    # M is deliberately not a multiple of the tile to exercise padding + grid.
    M, d, h = 260, 128, 256
    key = jax.random.PRNGKey(0)
    k_params, k_d, k_pre, k_cur = jax.random.split(key, 4)

    params = _init_params(k_params, d, h)
    d_vec = jax.random.normal(k_d, (M, d), jnp.float32)
    pre_vec = jax.random.normal(k_pre, (M, d), jnp.float32)
    cur_d_vec = jax.random.normal(k_cur, (M, d), jnp.float32)

    ok = True
    for cat_msg in (False, True):
        out = aggregate_maxpool_enc(d_vec, pre_vec, cur_d_vec, params,
                                    w=0.7, cat_msg=cat_msg)
        out = jax.block_until_ready(out)
        ref = _reference(d_vec, pre_vec, cur_d_vec, params,
                         w=0.7, cat_msg=cat_msg)
        ok = ok and bool(jnp.allclose(out, ref, atol=2e-2, rtol=2e-2))

    print("KERNEL_OK" if ok else "KERNEL_MISMATCH")
</pallas_src>

<mosaic_0001>
module attributes {stable_mosaic.version = 11 : i64} {
  func.func @_agg_kernel_nocat(%arg0: i32, %arg1: memref<1xf32, #tpu.memory_space<smem>>, %arg2: memref<256x128xf32, #tpu.memory_space<vmem>>, %arg3: memref<256x128xf32, #tpu.memory_space<vmem>>, %arg4: memref<128x256xbf16, #tpu.memory_space<vmem>>, %arg5: memref<1x256xf32, #tpu.memory_space<vmem>>, %arg6: memref<256x128xbf16, #tpu.memory_space<vmem>>, %arg7: memref<1x128xf32, #tpu.memory_space<vmem>>, %arg8: memref<256x128xf32, #tpu.memory_space<vmem>>) attributes {dimension_semantics = [#tpu.dimension_semantics<parallel>], iteration_bounds = array<i64: 2>, scalar_prefetch = 1 : i64, scratch_operands = 0 : i64, tpu.core_type = #tpu.core_type<tc>, window_params = [{transform_indices = @transform_0, window_bounds = array<i64: 256, 128>}, {transform_indices = @transform_1, window_bounds = array<i64: 256, 128>}, {pipeline_mode = #tpu.pipeline_mode<synchronous>, transform_indices = @transform_2, window_bounds = array<i64: 128, 256>}, {pipeline_mode = #tpu.pipeline_mode<synchronous>, transform_indices = @transform_3, window_bounds = array<i64: 1, 256>}, {pipeline_mode = #tpu.pipeline_mode<synchronous>, transform_indices = @transform_4, window_bounds = array<i64: 256, 128>}, {pipeline_mode = #tpu.pipeline_mode<synchronous>, transform_indices = @transform_5, window_bounds = array<i64: 1, 128>}, {transform_indices = @transform_6, window_bounds = array<i64: 256, 128>}]} {
    %c0 = arith.constant 0 : index
    %c0_0 = arith.constant 0 : index
    %0 = vector.load %arg2[%c0, %c0_0] : memref<256x128xf32, #tpu.memory_space<vmem>>, vector<256x128xf32>
    %1 = arith.truncf %0 : vector<256x128xf32> to vector<256x128xbf16>
    %c0_1 = arith.constant 0 : index
    %c0_2 = arith.constant 0 : index
    %2 = vector.load %arg4[%c0_1, %c0_2] : memref<128x256xbf16, #tpu.memory_space<vmem>>, vector<128x256xbf16>
    %cst = arith.constant dense<0.000000e+00> : vector<256x256xf32>
    %3 = tpu.matmul %1, %2, %cst {dimension_numbers = #tpu.dot_dimension_numbers<[1], [0], [0], [1], [0, 0, 1, 1], [], []>} : vector<256x128xbf16>, vector<128x256xbf16>, vector<256x256xf32> -> vector<256x256xf32>
    %c0_3 = arith.constant 0 : index
    %c0_4 = arith.constant 0 : index
    %4 = vector.load %arg5[%c0_3, %c0_4] : memref<1x256xf32, #tpu.memory_space<vmem>>, vector<1x256xf32>
    %5 = vector.broadcast %4 : vector<1x256xf32> to vector<256x256xf32>
    %6 = arith.addf %3, %5 : vector<256x256xf32>
    %cst_5 = arith.constant 0.000000e+00 : f32
    %7 = vector.broadcast %cst_5 : f32 to vector<256x256xf32>
    %8 = arith.maximumf %6, %7 : vector<256x256xf32>
    %9 = arith.truncf %8 : vector<256x256xf32> to vector<256x256xbf16>
    %c0_6 = arith.constant 0 : index
    %c0_7 = arith.constant 0 : index
    %10 = vector.load %arg6[%c0_6, %c0_7] : memref<256x128xbf16, #tpu.memory_space<vmem>>, vector<256x128xbf16>
    %cst_8 = arith.constant dense<0.000000e+00> : vector<256x128xf32>
    %11 = tpu.matmul %9, %10, %cst_8 {dimension_numbers = #tpu.dot_dimension_numbers<[1], [0], [0], [1], [0, 0, 1, 1], [], []>} : vector<256x256xbf16>, vector<256x128xbf16>, vector<256x128xf32> -> vector<256x128xf32>
    %c0_9 = arith.constant 0 : index
    %c0_10 = arith.constant 0 : index
    %12 = vector.load %arg7[%c0_9, %c0_10] : memref<1x128xf32, #tpu.memory_space<vmem>>, vector<1x128xf32>
    %13 = vector.broadcast %12 : vector<1x128xf32> to vector<256x128xf32>
    %14 = arith.addf %11, %13 : vector<256x128xf32>
    %c0_11 = arith.constant 0 : index
    %c0_12 = arith.constant 0 : index
    %15 = vector.load %arg3[%c0_11, %c0_12] : memref<256x128xf32, #tpu.memory_space<vmem>>, vector<256x128xf32>
    %c0_13 = arith.constant 0 : index
    %16 = memref.load %arg1[%c0_13] : memref<1xf32, #tpu.memory_space<smem>>
    %17 = vector.broadcast %16 : f32 to vector<256x128xf32>
    %18 = arith.mulf %14, %17 : vector<256x128xf32>
    %19 = arith.maximumf %15, %18 : vector<256x128xf32>
    %c0_14 = arith.constant 0 : index
    %c0_15 = arith.constant 0 : index
    %20 = vector.load %arg8[%c0_14, %c0_15] : memref<256x128xf32, #tpu.memory_space<vmem>>, vector<256x128xf32>
    tpu.vector_store %arg8[%c0_14, %c0_15], %19 {strides = array<i32>} : memref<256x128xf32, #tpu.memory_space<vmem>>, vector<256x128xf32>,
    return
  }
  func.func @transform_0(%arg0: i32, %arg1: memref<1xf32, #tpu.memory_space<smem>>) -> (i32, i32) {
    %c0_i32 = arith.constant 0 : i32
    %c0_i32_0 = arith.constant 0 : i32
    return %arg0, %c0_i32 : i32, i32
  }
  func.func @transform_1(%arg0: i32, %arg1: memref<1xf32, #tpu.memory_space<smem>>) -> (i32, i32) {
    %c0_i32 = arith.constant 0 : i32
    %c0_i32_0 = arith.constant 0 : i32
    return %arg0, %c0_i32 : i32, i32
  }
  func.func @transform_2(%arg0: i32, %arg1: memref<1xf32, #tpu.memory_space<smem>>) -> (i32, i32) {
    %c0_i32 = arith.constant 0 : i32
    %c0_i32_0 = arith.constant 0 : i32
    %c0_i32_1 = arith.constant 0 : i32
    return %c0_i32, %c0_i32_0 : i32, i32
  }
  func.func @transform_3(%arg0: i32, %arg1: memref<1xf32, #tpu.memory_space<smem>>) -> (i32, i32) {
    %c0_i32 = arith.constant 0 : i32
    %c0_i32_0 = arith.constant 0 : i32
    %c0_i32_1 = arith.constant 0 : i32
    return %c0_i32, %c0_i32_0 : i32, i32
  }
  func.func @transform_4(%arg0: i32, %arg1: memref<1xf32, #tpu.memory_space<smem>>) -> (i32, i32) {
    %c0_i32 = arith.constant 0 : i32
    %c0_i32_0 = arith.constant 0 : i32
    %c0_i32_1 = arith.constant 0 : i32
    return %c0_i32, %c0_i32_0 : i32, i32
  }
  func.func @transform_5(%arg0: i32, %arg1: memref<1xf32, #tpu.memory_space<smem>>) -> (i32, i32) {
    %c0_i32 = arith.constant 0 : i32
    %c0_i32_0 = arith.constant 0 : i32
    %c0_i32_1 = arith.constant 0 : i32
    return %c0_i32, %c0_i32_0 : i32, i32
  }
  func.func @transform_6(%arg0: i32, %arg1: memref<1xf32, #tpu.memory_space<smem>>) -> (i32, i32) {
    %c0_i32 = arith.constant 0 : i32
    %c0_i32_0 = arith.constant 0 : i32
    return %arg0, %c0_i32 : i32, i32
  }
}

</mosaic_0001>

<bundles_post_ra>
// kernel: tpu_custom_call.1
= control target key start
LH: loop header
LB: loop body
LE: loop exit
PB: predicated region body
PF: predicated region fallthrough
CT: control target
= control target key end

     0   :  { %s2440_s0 = inlined_call_operand.<no memory space> [shape: f32[1], index: 0, kind: input, shape index: {}]   ;;  %s2441_s1 = inlined_call_operand.hbm [shape: f32[512,128], index: 1, kind: input, shape index: {}]   ;;  %s2442_s2 = inlined_call_operand.hbm [shape: f32[512,128], index: 2, kind: input, shape index: {}]   ;;  %s2443_s3 = inlined_call_operand.hbm [shape: bf16[128,256], index: 3, kind: input, shape index: {}]   ;;  %s2444_s4 = inlined_call_operand.vmem [shape: f32[1,256], index: 4, kind: input, shape index: {}]   ;;  %s2445_s5 = inlined_call_operand.hbm [shape: bf16[256,128], index: 5, kind: input, shape index: {}]   ;;  %s2446_s6 = inlined_call_operand.vmem [shape: f32[1,128], index: 6, kind: input, shape index: {}]   ;;  %s2447_s7 = inlined_call_operand.hbm [shape: f32[512,128], index: 7, kind: output, shape index: {}]  }
   0x1   :  { %2455 = sst [smem:[#allocation18_spill]] %s2441_s1 }
   0x2   :  { %2456 = sst [smem:[#allocation19_spill]] %s2443_s3 }
   0x3   :  { %2457 = sst [smem:[#allocation20_spill]] %s2445_s5 }
   0x4   :  { %12 = sst [smem:[#allocation3]] %s2440_s0 }
   0x5   :  { %13 = vsyncpa [#allocation5], 0 }
   0x6   :  { %15 = vsyncpa [#allocation5 + $0x1], 0 }
   0x7   :  { %16 = vsyncpa [#allocation8], 0 }
   0x8   :  { %18 = vsyncpa [#allocation8 + $0x1], 0 }
   0x9   :  { %19 = vsyncpa [#allocation11], 0 }
   0xa   :  { %20 = vsyncpa [#allocation6], 0 }
   0xb   :  { %22 = vsyncpa [#allocation6 + $0x1], 0  ;;  %s1885_s26 = smov 0   ;;  %s1887_s27 = smov 0  }
   0xc   :  { %s1889_s28 = smov 0   ;;  %s1891_s29 = smov 0  }
   0xd LB: > { %s1906_s0 = sadd.s32 4294967295, %s1828_s29   ;;  %s1345_s30 = sadd.s32 4294967294, %s1828_s29   ;;  %s1828_s29 = sphi %s1891_s29, %s2481_s29   ;;  %s1824_s28 = sphi %s1889_s28, %s2480_s28   ;;  %s1820_s27 = sphi %s1887_s27, %s2479_s27   ;;  %s1816_s26 = sphi %s1885_s26, %s2478_s26  }
   0xe   : > { %p48_p0 = scmp.ne.s32.totalorder %s1820_s27, %s1816_s26  ;;  %p2448_p1 = scmp.eq.s32.totalorder %s1906_s0, 0 }
   0xf   : > { %p188_p3 = scmp.eq.s32.totalorder %s1345_s30, 1  ;;  %p1346_p5 = scmp.ge.s32.totalorder %s1828_s29, 1 }
  0x10   : > { %p1915_p4 = por %p2448_p1, %p48_p0  ;;  %p195_p7 = scmp.lt.s32.totalorder %s1828_s29, 3 }
  0x11   : > { %p1920_p6 = por %p188_p3, %p48_p0  ;;  %s1830_s11 = smov [#allocation9]  }
  0x12   : > { %s2458_s8 = scalar_select %p1915_p4, 1, 0 }
  0x13   : > { %s2459_s9 = scalar_select %p1920_p6, 1, 0 }
  0x14   : > { %p1925_p8 = pnand %p1346_p5, %p195_p7  ;;  %s207_s12 = sshll.u32 %s1830_s11, 4  ;;  %s1929_s12 = int_to_ptr.vmem [resolvable:$true] %s207_s12 }
  0x15   : > { %s1831_s14 = smov [#allocation10]   ;;  %s2462_s3 = sld [smem:[#allocation19_spill]] }
  0x16   : > { %p1529_p9 = pneg %p1925_p8  ;;  %s223_s15 = sshll.u32 %s1831_s14, 4  ;;  %s1940_s15 = int_to_ptr.vmem [resolvable:$true] %s223_s15 }
  0x18   : > { %p1936_p11 = pnand %p1529_p9, %p2448_p1 }
  0x1a   : > { %p1636_p13 = pneg %p1936_p11 }
  0x1b   : > { %s1634_s18 = scalar_lea.hbm %s2462_s3, 2048 }
  0x1c   : > { %p1635_p12 = scmp.ne.s32.totalorder %s2462_s3, %s1634_s18  ;;  %p1641_p5 = scmp.lt.u32.totalorder %s1634_s18, %s2462_s3 }
  0x1e   : > { %p1637_p0 = pnand %p1636_p13, %p1635_p12 }
  0x20   : > { %p1638_p3 = pneg %p1637_p0 }
  0x22   : > { %p1643_p7 = pnand %p1641_p5, %p1638_p3 }
  0x24   : > { %1646 = shalt.err (!%p1643_p7)
}
  0x25   : > { %s1647_s23 = scalar_lea.vmem %s1929_s12, 2048  ;;  %p1655_p2 = scmp.lt.s32.totalorder %s1929_s12, %s1929_s12 }
  0x26   : > { %p1648_p9 = scmp.ne.s32.totalorder %s1929_s12, %s1647_s23  ;;  %p1656_p12 = scmp.lt.s32.totalorder %s1647_s23, %s1647_s23 }
  0x28   : > { %p1650_p10 = pnand %p1648_p9, %p1636_p13  ;;  %p1657_p0 = por %p1656_p12, %p1655_p2 }
  0x2a   : > { %p1651_p1 = pneg %p1650_p10 }
  0x2c   : > { %p1658_p6 = pnand %p1657_p0, %p1651_p1 }
  0x2e   : > { %1661 = shalt.err (!%p1658_p6)
}
  0x2f   : > { %s2449_s24 = smov 128   ;;  %s2451_s25 = smov 8  }
  0x30   : > { %1532 = dma.hbm_to_vmem [thread:$0]  (!%p1936_p11), %s2462_s3, 2048, %s1929_s12, [#allocation8], %s2449_s24, %s2449_s24, %s2451_s25  }
  0x31   : > { %s2463_s5 = sld [smem:[#allocation20_spill]] }
  0x37   : > { %s1662_s17 = scalar_lea.hbm %s2463_s5, 2048 }
  0x38   : > { %p1663_p1 = scmp.ne.s32.totalorder %s2463_s5, %s1662_s17  ;;  %p1669_p10 = scmp.lt.u32.totalorder %s1662_s17, %s2463_s5 }
  0x3a   : > { %p1665_p2 = pnand %p1663_p1, %p1636_p13 }
  0x3c   : > { %p1666_p6 = pneg %p1665_p2 }
  0x3e   : > { %p1671_p3 = pnand %p1669_p10, %p1666_p6 }
  0x40   : > { %1674 = shalt.err (!%p1671_p3)
}
  0x41   : > { %s1675_s12 = scalar_lea.vmem %s1940_s15, 2048  ;;  %p1683_p12 = scmp.lt.s32.totalorder %s1940_s15, %s1940_s15 }
  0x42   : > { %p1676_p5 = scmp.ne.s32.totalorder %s1940_s15, %s1675_s12  ;;  %p1684_p0 = scmp.lt.s32.totalorder %s1675_s12, %s1675_s12 }
  0x44   : > { %p1678_p7 = pnand %p1676_p5, %p1636_p13  ;;  %p1685_p1 = por %p1684_p0, %p1683_p12 }
  0x46   : > { %p1679_p9 = pneg %p1678_p7 }
  0x48   : > { %p1686_p2 = pnand %p1685_p1, %p1679_p9 }
  0x4a   : > { %1689 = shalt.err (!%p1686_p2)
}
  0x4b   : > { %s1834_s22 = smov 64   ;;  %s1835_s23 = smov 4  }
  0x4c   : > { %1535 = dma.hbm_to_vmem [thread:$0]  (!%p1936_p11), %s2463_s5, 2048, %s1940_s15, [#allocation11], %s1834_s22, %s1834_s22, %s1835_s23  }
  0x4d   : > { %s1998_s14 = sadd.s32 1, %s1828_s29   ;;  %s35_s17 = sadd.s32 1, %s1824_s28 }
  0x4e   : > { %s32_s16 = ssub.s32 %s1828_s29, %s1998_s14  ;;  %p42_p6 = scmp.ne.s32.totalorder %s1824_s28, %s1820_s27 }
  0x4f   : > { %p33_p13 = scmp.eq.s32.totalorder %s32_s16, 0  ;;  %p43_p10 = scmp.eq.s32.totalorder %s1828_s29, 0 }
  0x50   : > { %p2464_p5 = scmp.eq.s32.totalorder %s1906_s0, 1  ;;  %p1549_p9 = scmp.lt.s32.totalorder %s1828_s29, 2 }
  0x51   : > { %s2007_s18 = scalar_select %p33_p13, %s1824_s28, %s35_s17  }
  0x52   : > { %p44_p3 = por %p43_p10, %p42_p6  ;;  %p2011_p7 = por %p2464_p5, %p42_p6 }
  0x53   : > { %s240_s13 = sand.u32 1, %s1824_s28   ;;  %s1400_s15 = sshll.u32 %s1828_s29, 12 }
  0x54   : > { %s2465_s19 = scalar_select %p2011_p7, 1, 0 }
  0x55   : > { %s1350_s20 = sshll.u32 %s240_s13, 8  ;;  %s2466_s1 = sld [smem:[#allocation18_spill]] }
  0x56   : > { %s244_s23 = scalar_lea.vmem [#allocation4], %s1350_s20  ;;  %p2025_p11 = pnand %p1549_p9, %p44_p3 }
  0x57   : > { %s251_s30 = sshll.u32 %s244_s23, 4  ;;  %s2032_s21 = scalar_lea.hbm %s2442_s2, %s1400_s15  ;;  %s2023_s30 = int_to_ptr.vmem [resolvable:$true] %s251_s30 }
  0x58   : > { %s265_s12 = scalar_lea.vmem [#allocation7], %s1350_s20  ;;  %s2036_s25 = scalar_lea.sflag [#allocation5], %s240_s13 }
  0x59   : > { %s2034_s24 = sshll.u32 %s265_s12, 4  ;;  %p1692_p0 = pneg %p2025_p11  ;;  %s2068_s24 = int_to_ptr.vmem [resolvable:$true] %s2034_s24 }
  0x5b   : > { %s2021_s22 = scalar_lea.hbm %s2466_s1, %s1400_s15  ;;  %s1695_s16 = scalar_lea.hbm %s2466_s1, 8192 }
  0x5c   : > { %s1690_s23 = scalar_lea.hbm %s2021_s22, 4096  ;;  %p1696_p13 = scmp.lt.u32.totalorder %s2021_s22, %s2466_s1 }
  0x5d   : > { %p1691_p12 = scmp.ne.s32.totalorder %s2021_s22, %s1690_s23  ;;  %p1697_p6 = scmp.lt.u32.totalorder %s1695_s16, %s1690_s23 }
  0x5e   : > { %p1699_p3 = scmp.lt.u32.totalorder %s1690_s23, %s2021_s22 }
  0x5f   : > { %p1693_p1 = pnand %p1692_p0, %p1691_p12  ;;  %p1698_p10 = por %p1697_p6, %p1696_p13 }
  0x61   : > { %p1694_p2 = pneg %p1693_p1  ;;  %p1700_p5 = por %p1699_p3, %p1698_p10 }
  0x63   : > { %p1701_p9 = pnand %p1700_p5, %p1694_p2 }
  0x65   : > { %1704 = shalt.err (!%p1701_p9)
}
  0x66   : > { %s1705_s13 = scalar_lea.vmem %s2023_s30, 4096  ;;  %s1836_s3 = smov [#allocation4]  }
  0x67   : > { %p1706_p12 = scmp.ne.s32.totalorder %s2023_s30, %s1705_s13  ;;  %s1710_s5 = sshll.u32 %s1836_s3, 4  ;;  %s1711_s5 = int_to_ptr.vmem [resolvable:$false] %s1710_s5 }
  0x68   : > { %s1712_s20 = scalar_lea.vmem %s1711_s5, 8192  ;;  %p1713_p4 = scmp.lt.s32.totalorder %s2023_s30, %s1711_s5 }
  0x69   : > { %p1708_p1 = pnand %p1706_p12, %p1692_p0  ;;  %p1714_p13 = scmp.lt.s32.totalorder %s1712_s20, %s1705_s13 }
  0x6b   : > { %p1709_p7 = pneg %p1708_p1  ;;  %p1715_p6 = por %p1714_p13, %p1713_p4 }
  0x6d   : > { %p1716_p10 = pnand %p1715_p6, %p1709_p7 }
  0x6f   : > { %1719 = shalt.err (!%p1716_p10)
}
  0x70   : > { %s2468_s12 = smov 8   ;;  %s2469_s23 = smov 128  }
  0x71   : > { %1539 = dma.hbm_to_vmem [thread:$0]  (!%p2025_p11), %s2021_s22, 4096, %s2023_s30, %s2036_s25, %s2469_s23, %s2469_s23, %s2468_s12  }
  0x72   : > { %s261_s16 = sand.u32 1, %s1828_s29   ;;  %s1720_s15 = scalar_lea.hbm %s2032_s21, 4096 }
  0x73   : > { %s2071_s17 = scalar_lea.sflag [#allocation8], %s261_s16  ;;  %p1721_p4 = scmp.ne.s32.totalorder %s2032_s21, %s1720_s15 }
  0x74   : > { %s1725_s5 = scalar_lea.hbm %s2442_s2, 8192  ;;  %p1726_p3 = scmp.lt.u32.totalorder %s2032_s21, %s2442_s2 }
  0x75   : > { %p1723_p7 = pnand %p1721_p4, %p1692_p0  ;;  %p1727_p5 = scmp.lt.u32.totalorder %s1725_s5, %s1720_s15 }
  0x76   : > { %p1729_p12 = scmp.lt.u32.totalorder %s1720_s15, %s2032_s21 }
  0x77   : > { %p1724_p2 = pneg %p1723_p7  ;;  %p1728_p9 = por %p1727_p5, %p1726_p3 }
  0x79   : > { %p1730_p1 = por %p1729_p12, %p1728_p9 }
  0x7b   : > { %p1731_p13 = pnand %p1730_p1, %p1724_p2 }
  0x7d   : > { %1734 = shalt.err (!%p1731_p13)
}
  0x7e   : > { %s1735_s25 = scalar_lea.vmem %s2068_s24, 4096  ;;  %s1837_s22 = smov [#allocation7]  }
  0x7f   : > { %p1736_p6 = scmp.ne.s32.totalorder %s2068_s24, %s1735_s25  ;;  %s1740_s30 = sshll.u32 %s1837_s22, 4  ;;  %s1741_s30 = int_to_ptr.vmem [resolvable:$false] %s1740_s30 }
  0x80   : > { %s1742_s1 = scalar_lea.vmem %s1741_s30, 8192  ;;  %p1743_p7 = scmp.lt.s32.totalorder %s2068_s24, %s1741_s30 }
  0x81   : > { %p1738_p10 = pnand %p1736_p6, %p1692_p0  ;;  %p1744_p3 = scmp.lt.s32.totalorder %s1742_s1, %s1735_s25 }
  0x83   : > { %p1739_p4 = pneg %p1738_p10  ;;  %p1745_p5 = por %p1744_p3, %p1743_p7 }
  0x85   : > { %p1746_p9 = pnand %p1745_p5, %p1739_p4 }
  0x87   : > { %1749 = shalt.err (!%p1746_p9)
}
  0x88   : > { %1542 = dma.hbm_to_vmem [thread:$0]  (!%p2025_p11), %s2032_s21, 4096, %s2068_s24, %s2071_s17, %s2469_s23, %s2469_s23, %s2468_s12  }
  0x89   : > { %284 = sbr.rel (%p1925_p8) target bundleno = 767 (0x2ff), region = 44  ;;  %s2103_s16 = sand.u32 (!%p1925_p8), 1, %s1820_s27  }
  0x8a   : > { %s2106_s15 = sshll.u32 (!%p1925_p8), %s2103_s16, 8  ;;  %s287_s11 = scalar_lea.sflag (!%p1925_p8), [#allocation5], %s2103_s16 }
  0x8b   : > { %s2110_s13 = scalar_lea.vmem (!%p1925_p8), [#allocation4], %s2106_s15  ;;  %p2470_p0 = scmp.ne.s32.totalorder (!%p1925_p8), %s2458_s8, 0 }
  0x90   : > { %1795 = dma.done.wait (%p2470_p0), %s287_s11, 4096  }
  0x91   : > { %1797 = vsyncadd (%p2470_p0), %s287_s11, 4294963200  ;;  %s295_s10 = sand.u32 1, %s1906_s0   ;;  %s2118_s21 = scalar_lea.vmem [#allocation7], %s2106_s15 }
  0x92   : > { %s296_s24 = scalar_lea.sflag [#allocation8], %s295_s10 }
  0x93   : > { %1799 = dma.done.wait (%p2470_p0), %s296_s24, 4096  }
  0x94   : > { %1801 = vsyncadd (%p2470_p0), %s296_s24, 4294963200  ;;  %p2471_p8 = scmp.eq.s32.totalorder %s1906_s0, 0 }
  0x96   : > { %1803 = dma.done.wait (%p2471_p8), [#allocation8], 2048   ;;  %p2472_p11 = pmov %p2471_p8 }
  0x97   : > { %p2473_p2 = pmov %p2471_p8 }
  0x98   : > { %1805 = vsyncadd (%p2472_p11), [#allocation8], 4294965248 }
  0x99   : > { %1807 = dma.done.wait (%p2473_p2), [#allocation11], 2048   ;;  %p2474_p12 = pmov %p2473_p2 }
  0x9a   : > { %v1838_v0 = vmov 0   ;;  %v1594_v1 = vld [vmem:[#allocation9 + $0x4] ss:$8 sps:$4 sm:$0xff]   ;;  %v1596_v2 = vld [vmem:[#allocation9] ss:$8 sps:$4 sm:$0xff]   ;;  %v1622_v24 = vld [vmem:[#allocation10 + $0x50] sm:$0xff]  }
  0x9b   : > { %1809 = vsyncadd (%p2474_p12), [#allocation11], 4294965248  ;;  %533 = vmatprep.mubr.bf16.mxu0 %v1838_v0  ;;  %501 = vmatprep.subr.bf16.mxu0 %v1594_v1  ;;  %v1597_v3 = vld [vmem:[#allocation9 + $0x14] ss:$8 sps:$4 sm:$0xff]   ;;  %v1599_v4 = vld [vmem:[#allocation9 + $0x10] ss:$8 sps:$4 sm:$0xff]  }
  0x9c   : > { %502 = vmatpush1.bf16.msra.mxu0 %v1596_v2  ;;  %v1600_v5 = vld [vmem:[#allocation9 + $0x24] ss:$8 sps:$4 sm:$0xff]   ;;  %v1602_v6 = vld [vmem:[#allocation9 + $0x20] ss:$8 sps:$4 sm:$0xff]   ;;  %v1603_v7 = vld [vmem:[#allocation9 + $0x34] ss:$8 sps:$4 sm:$0xff]  }
  0x9d   : > { %503 = vmatprep.subr.bf16.mxu0 %v1597_v3  ;;  %v1605_v8 = vld [vmem:[#allocation9 + $0x30] ss:$8 sps:$4 sm:$0xff]   ;;  %v1606_v9 = vld [vmem:[#allocation9 + $0x44] ss:$8 sps:$4 sm:$0xff]   ;;  %v1608_v10 = vld [vmem:[#allocation9 + $0x40] ss:$8 sps:$4 sm:$0xff]  }
  0x9e   : > { %v1609_v11 = vld [vmem:[#allocation9 + $0x54] ss:$8 sps:$4 sm:$0xff]   ;;  %v1611_v12 = vld [vmem:[#allocation9 + $0x50] ss:$8 sps:$4 sm:$0xff]   ;;  %v1612_v13 = vld [vmem:[#allocation9 + $0x64] ss:$8 sps:$4 sm:$0xff]  }
  0x9f   : > { %v1614_v14 = vld [vmem:[#allocation9 + $0x60] ss:$8 sps:$4 sm:$0xff]   ;;  %v1615_v15 = vld [vmem:[#allocation9 + $0x74] ss:$8 sps:$4 sm:$0xff]   ;;  %v1617_v19 = vld [vmem:[#allocation9 + $0x70] ss:$8 sps:$4 sm:$0xff]  }
  0xa0   : > { %504 = vmatpush1.bf16.msra.mxu0 %v1599_v4  ;;  %v1618_v16 = vld [vmem:[#allocation10 + $0x40] sm:$0xff]   ;;  %v1620_v18 = vld [vmem:[#allocation10 + $0x48] sm:$0xff]   ;;  %v1623_v25 = vld [vmem:[#allocation10 + $0x10] sm:$0xff]   ;;  %s1118_s23 = sld [smem:[#allocation3]]  ;;  %s2265_s5 = scalar_lea.vmem [#allocation12], %s2106_s15 }
  0xa1   : > { %505 = vmatprep.subr.bf16.mxu0 %v1600_v5  ;;  %v1619_v17 = vld [vmem:[#allocation10] sm:$0xff]   ;;  %v346_v21 = vld [vmem:[%s2110_s13 + $0x8] sm:$0xff]  ;;  %1403 = vmatprep.subr.bf16.mxu1 %v1618_v16  ;;  %v1624_v26 = vld [vmem:[#allocation10 + $0x58] sm:$0xff]   ;;  %s1402_s20 = sshll.u32 %s1906_s0, 12  ;;  %s1230_s25 = sshll.u32 %s2265_s5, 4  ;;  %s2394_s25 = int_to_ptr.vmem [resolvable:$true] %s1230_s25 }
  0xa2   : > { %v345_v20 = vld [vmem:[%s2110_s13] sm:$0xff]  ;;  %1404 = vmatpush3.bf16.msra.mxu1 %v1619_v17  ;;  %v1621_v22 = vld [vmem:[#allocation10 + $0x8] sm:$0xff]   ;;  %v347_v27 = vld [vmem:[%s2110_s13 + $0x10] sm:$0xff]  ;;  %s2392_s1 = scalar_lea.hbm %s2447_s7, %s1402_s20  ;;  %s1217_s15 = scalar_lea.sflag [#allocation6], %s2103_s16 }
  0xa3   : > { %v377_v23 = vpack.c.bf16 %v346_v21, %v345_v20  ;;  %1405 = vmatprep.subr.bf16.mxu1 %v1620_v18  ;;  %v348_v28 = vld [vmem:[%s2110_s13 + $0x18] sm:$0xff]  ;;  %v1626_v31 = vld [vmem:[#allocation10 + $0x60] sm:$0xff]   ;;  %v1628_v33 = vld [vmem:[#allocation10 + $0x68] sm:$0xff]   ;;  %v411_v18 = vlaneseq  ;;  %s1750_s0 = scalar_lea.vmem %s2394_s25, 4096  ;;  %p2475_p13 = scmp.ne.s32.totalorder %s2465_s19, 0 }
  0xa4   : > { %506 = vmatpush1.bf16.msra.mxu0 %v1602_v6  ;;  %v1625_v29 = vld [vmem:[#allocation10 + $0x18] sm:$0xff]   ;;  %v378_v30 = vpack.c.bf16 %v348_v28, %v347_v27  ;;  %v1627_v32 = vld [vmem:[#allocation10 + $0x20] sm:$0xff]   ;;  %v350_v35 = vld [vmem:[%s2110_s13 + $0x28] sm:$0xff]  ;;  %p1751_p1 = scmp.ne.s32.totalorder %s2394_s25, %s1750_s0  ;;  %s1839_s11 = smov [#allocation12]  }
  0xa5   : > { %507 = vmatprep.subr.bf16.mxu0 %v1603_v7  ;;  %v349_v34 = vld [vmem:[%s2110_s13 + $0x20] sm:$0xff]  ;;  %v351_v37 = vld [vmem:[%s2110_s13 + $0x30] sm:$0xff]  ;;  %v352_v38 = vld [vmem:[%s2110_s13 + $0x38] sm:$0xff] }
  0xa6   : > { %1406 = vmatpush3.bf16.msra.mxu1 %v1621_v22  ;;  %v379_v36 = vpack.c.bf16 %v350_v35, %v349_v34  ;;  %v380_v39 = vpack.c.bf16 %v352_v38, %v351_v37  ;;  %v353_v40 = vld [vmem:[%s2110_s13 + $0x40] sm:$0xff]  ;;  %v354_v41 = vld [vmem:[%s2110_s13 + $0x48] sm:$0xff]  ;;  %v355_v43 = vld [vmem:[%s2110_s13 + $0x50] sm:$0xff]  ;;  %p1752_p6 = pnand %p1751_p1, %p2475_p13 }
  0xa7   : > { %1407 = vmatprep.subr.bf16.mxu1 %v1622_v24  ;;  %v381_v42 = vpack.c.bf16 %v354_v41, %v353_v40  ;;  %v356_v44 = vld [vmem:[%s2110_s13 + $0x58] sm:$0xff]  ;;  %v357_v46 = vld [vmem:[%s2110_s13 + $0x60] sm:$0xff]  ;;  %v358_v47 = vld [vmem:[%s2110_s13 + $0x68] sm:$0xff] }
  0xa8   : > { %508 = vmatpush1.bf16.msra.mxu0 %v1605_v8  ;;  %v382_v45 = vpack.c.bf16 %v356_v44, %v355_v43  ;;  %v383_v48 = vpack.c.bf16 %v358_v47, %v357_v46  ;;  %v359_v49 = vld [vmem:[%s2110_s13 + $0x70] sm:$0xff]  ;;  %v360_v50 = vld [vmem:[%s2110_s13 + $0x78] sm:$0xff]  ;;  %v361_v52 = vld [vmem:[%s2110_s13 + $0x80] sm:$0xff]  ;;  %p1753_p10 = pneg %p1752_p6 }
  0xa9   : > { %509 = vmatprep.subr.bf16.mxu0 %v1606_v9  ;;  %v384_v51 = vpack.c.bf16 %v360_v50, %v359_v49  ;;  %v362_v53 = vld [vmem:[%s2110_s13 + $0x88] sm:$0xff]  ;;  %v363_v55 = vld [vmem:[%s2110_s13 + $0x90] sm:$0xff]  ;;  %v364_v56 = vld [vmem:[%s2110_s13 + $0x98] sm:$0xff] }
  0xaa   : > { %1408 = vmatpush3.bf16.msra.mxu1 %v1623_v25  ;;  %v385_v54 = vpack.c.bf16 %v362_v53, %v361_v52  ;;  %v386_v57 = vpack.c.bf16 %v364_v56, %v363_v55  ;;  %v365_v58 = vld [vmem:[%s2110_s13 + $0xa0] sm:$0xff]  ;;  %v366_v59 = vld [vmem:[%s2110_s13 + $0xa8] sm:$0xff]  ;;  %v367_v61 = vld [vmem:[%s2110_s13 + $0xb0] sm:$0xff] }
  0xab   : > { %1409 = vmatprep.subr.bf16.mxu1 %v1624_v26  ;;  %v387_v60 = vpack.c.bf16 %v366_v59, %v365_v58  ;;  %v368_v62 = vld [vmem:[%s2110_s13 + $0xb8] sm:$0xff]  ;;  %v1629_v63 = vld [vmem:[#allocation10 + $0x28] sm:$0xff]   ;;  %v1630_v2 = vld [vmem:[#allocation10 + $0x70] sm:$0xff]  }
  0xac   : > { %510 = vmatpush1.bf16.msra.mxu0 %v1608_v10  ;;  %v388_v1 = vpack.c.bf16 %v368_v62, %v367_v61  ;;  %v1631_v3 = vld [vmem:[#allocation10 + $0x30] sm:$0xff]   ;;  %v1632_v4 = vld [vmem:[#allocation10 + $0x78] sm:$0xff]   ;;  %v369_v5 = vld [vmem:[%s2110_s13 + $0xc0] sm:$0xff] }
  0xad   : > { %511 = vmatprep.subr.bf16.mxu0 %v1609_v11  ;;  %v370_v6 = vld [vmem:[%s2110_s13 + $0xc8] sm:$0xff]  ;;  %v1633_v7 = vld [vmem:[#allocation10 + $0x38] sm:$0xff]   ;;  %v371_v9 = vld [vmem:[%s2110_s13 + $0xd0] sm:$0xff] }
  0xae   : > { %1410 = vmatpush3.bf16.msra.mxu1 %v1625_v29  ;;  %v389_v8 = vpack.c.bf16 %v370_v6, %v369_v5  ;;  %v372_v10 = vld [vmem:[%s2110_s13 + $0xd8] sm:$0xff]  ;;  %v409_v21 = vld [vmem:[%s2444_s4] sm:$0x3] }
  0xaf   : > { %1411 = vmatprep.subr.bf16.mxu1 %v1626_v31  ;;  %v390_v11 = vpack.c.bf16 %v372_v10, %v371_v9  ;;  %v376_v16 = vld [vmem:[%s2110_s13 + $0xf8] sm:$0xff] }
  0xb0   : > { %512 = vmatpush1.bf16.msra.mxu0 %v1611_v12  ;;  %v373_v12 = vld [vmem:[%s2110_s13 + $0xe0] sm:$0xff] }
  0xb1   : > { %513 = vmatprep.subr.bf16.mxu0 %v1612_v13  ;;  %v374_v13 = vld [vmem:[%s2110_s13 + $0xe8] sm:$0xff] }
  0xb2   : > { %1412 = vmatpush3.bf16.msra.mxu1 %v1627_v32 }
  0xb3   : > { %1413 = vmatprep.subr.bf16.mxu1 %v1628_v33 }
  0xb4   : > { %514 = vmatpush1.bf16.msra.mxu0 %v1614_v14  ;;  %v391_v14 = vpack.c.bf16 %v374_v13, %v373_v12 }
  0xb5   : > { %515 = vmatprep.subr.bf16.mxu0 %v1615_v15  ;;  %v375_v15 = vld [vmem:[%s2110_s13 + $0xf0] sm:$0xff]  ;;  %s1754_s13 = sshll.u32 %s1839_s11, 4  ;;  %s1755_s13 = int_to_ptr.vmem [resolvable:$false] %s1754_s13 }
  0xb6   : > { %1414 = vmatpush3.bf16.msra.mxu1 %v1629_v63  ;;  %v392_v17 = vpack.c.bf16 %v376_v16, %v375_v15  ;;  %s1756_s10 = scalar_lea.vmem %s1755_s13, 8192  ;;  %p1757_p4 = scmp.lt.s32.totalorder %s2394_s25, %s1755_s13 }
  0xb7   : > { %1415 = vmatprep.subr.bf16.mxu1 %v1630_v2  ;;  %p1758_p7 = scmp.lt.s32.totalorder %s1756_s10, %s1750_s0 }
  0xb8   : > { %516 = vmatpush1.bf16.msra.mxu0 %v1617_v19  ;;  %v412_v19 = vshrl.u32 %v411_v18, 7 }
  0xb9   : > { %p1759_p3 = por %p1758_p7, %p1757_p4 }
  0xba   : > { %1416 = vmatpush3.bf16.msra.mxu1 %v1631_v3  ;;  %v413_v20 = vsub.s32 0, %v412_v19  ;;  %v417_v22 = vsub.s32 1, %v412_v19 }
  0xbb   : > { %534 = vmatmul.mubr.bf16.vlgmr.msra.gmra.mrb[0].mxu0 %v377_v23  ;;  %1417 = vmatprep.subr.bf16.mxu1 %v1632_v4  ;;  %p1760_p5 = pnand %p1759_p3, %p1753_p10 }
  0xbc   : > { %543 = vmatprep.mubr.bf16.mxu0 %v1838_v0  ;;  %v2183_v23 = vrot.slane %v409_v21, %v413_v20  ;;  %v2185_v24 = vrot.slane %v409_v21, %v417_v22 }
  0xbe   : > { %1418 = vmatpush3.bf16.msra.mxu1 %v1633_v7 }
  0xc3   : > { %544 = vmatmul.mubr.bf16.gmra.mrb[4].mxu0 %v378_v30 }
  0xc4   : > { %553 = vmatprep.mubr.bf16.mxu0 %v1838_v0 }
  0xcb   : > { %554 = vmatmul.mubr.bf16.gmra.mrb[8].mxu0 %v379_v36 }
  0xcc   : > { %563 = vmatprep.mubr.bf16.mxu0 %v1838_v0 }
  0xd3   : > { %564 = vmatmul.mubr.bf16.gmra.mrb[12].mxu0 %v380_v39 }
  0xd4   : > { %573 = vmatprep.mubr.bf16.mxu0 %v1838_v0 }
  0xdb   : > { %574 = vmatmul.mubr.bf16.gmra.mrb[16].mxu0 %v381_v42 }
  0xdc   : > { %583 = vmatprep.mubr.bf16.mxu0 %v1838_v0 }
  0xe3   : > { %584 = vmatmul.mubr.bf16.gmra.mrb[20].mxu0 %v382_v45 }
  0xe4   : > { %593 = vmatprep.mubr.bf16.mxu0 %v1838_v0 }
  0xeb   : > { %594 = vmatmul.mubr.bf16.gmra.mrb[24].mxu0 %v383_v48 }
  0xec   : > { %603 = vmatprep.mubr.bf16.mxu0 %v1838_v0 }
  0xf3   : > { %604 = vmatmul.mubr.bf16.gmra.mrb[28].mxu0 %v384_v51 }
  0xf4   : > { %613 = vmatprep.mubr.bf16.mxu0 %v1838_v0 }
  0xfb   : > { %614 = vmatmul.mubr.bf16.gmra.mrb[32].mxu0 %v385_v54 }
  0xfc   : > { %623 = vmatprep.mubr.bf16.mxu0 %v1838_v0 }
 0x103   : > { %624 = vmatmul.mubr.bf16.gmra.mrb[36].mxu0 %v386_v57 }
 0x104   : > { %633 = vmatprep.mubr.bf16.mxu0 %v1838_v0 }
 0x10b   : > { %634 = vmatmul.mubr.bf16.gmra.mrb[40].mxu0 %v387_v60 }
 0x10c   : > { %643 = vmatprep.mubr.bf16.mxu0 %v1838_v0 }
 0x113   : > { %644 = vmatmul.mubr.bf16.gmra.mrb[44].mxu0 %v388_v1 }
 0x114   : > { %653 = vmatprep.mubr.bf16.mxu0 %v1838_v0 }
 0x11b   : > { %654 = vmatmul.mubr.bf16.gmra.mrb[48].mxu0 %v389_v8 }
 0x11c   : > { %663 = vmatprep.mubr.bf16.mxu0 %v1838_v0 }
 0x123   : > { %664 = vmatmul.mubr.bf16.gmra.mrb[52].mxu0 %v390_v11 }
 0x124   : > { %673 = vmatprep.mubr.bf16.mxu0 %v1838_v0 }
 0x12b   : > { %674 = vmatmul.mubr.bf16.gmra.mrb[56].mxu0 %v391_v14 }
 0x12c   : > { %683 = vmatprep.mubr.bf16.mxu0 %v1838_v0 }
 0x133   : > { %684 = vmatmul.mubr.bf16.gmra.mrb[60].mxu0 %v392_v17 }
 0x18e   : > { %v535_v25 = vpop.f32.mrb[0].mxu0 }
 0x18f   : > { %v536_v26 = vadd.f32 %v535_v25, %v2183_v23  ;;  %v537_v0 = vpop.f32.mrb[1].mxu0 }
 0x190   : > { %v538_v27 = vadd.f32 %v537_v0, %v2185_v24  ;;  %v539_v28 = vpop.f32.mrb[2].mxu0 }
 0x191   : > { %v540_v29 = vadd.f32 %v539_v28, %v2183_v23  ;;  %v541_v30 = vpop.f32.mrb[3].mxu0  ;;  %v694_v32 = vmax.f32 %v536_v26, 0.0 }
 0x192   : > { %v542_v31 = vadd.f32 %v541_v30, %v2185_v24  ;;  %v695_v34 = vmax.f32 %v538_v27, 0.0 }
 0x193   : > { %v696_v33 = vmax.f32 %v540_v29, 0.0 }
 0x194   : > { %v697_v35 = vmax.f32 %v542_v31, 0.0 }
 0x195   : > { %v758_v36 = vpack.c.bf16 %v696_v33, %v694_v32 }
 0x196   : > { %v545_v37 = vpop.f32.mrb[4].mxu0  ;;  %v759_v38 = vpack.c.bf16 %v697_v35, %v695_v34 }
 0x197   : > { %v546_v39 = vadd.f32 %v545_v37, %v2183_v23  ;;  %v547_v40 = vpop.f32.mrb[5].mxu0 }
 0x198   : > { %v548_v41 = vadd.f32 %v547_v40, %v2185_v24  ;;  %v549_v42 = vpop.f32.mrb[6].mxu0  ;;  %957 = vmatprep.mubr.bf16.mxu1 %v759_v38 }
 0x199   : > { %v550_v43 = vadd.f32 %v549_v42, %v2183_v23  ;;  %v551_v44 = vpop.f32.mrb[7].mxu0  ;;  %958 = vmatmul.mubr.bf16.vlgmr.msra.gmra.mrb[0].mxu1 %v758_v36  ;;  %v698_v46 = vmax.f32 %v546_v39, 0.0 }
 0x19a   : > { %v552_v45 = vadd.f32 %v551_v44, %v2185_v24  ;;  %v699_v48 = vmax.f32 %v548_v41, 0.0 }
 0x19b   : > { %v700_v47 = vmax.f32 %v550_v43, 0.0 }
 0x19c   : > { %v701_v49 = vmax.f32 %v552_v45, 0.0 }
 0x19d   : > { %v760_v50 = vpack.c.bf16 %v700_v47, %v698_v46 }
 0x19e   : > { %v761_v51 = vpack.c.bf16 %v701_v49, %v699_v48  ;;  %v555_v52 = vpop.f32.mrb[8].mxu0 }
 0x19f   : > { %v556_v53 = vadd.f32 %v555_v52, %v2183_v23  ;;  %v557_v54 = vpop.f32.mrb[9].mxu0 }
 0x1a0   : > { %v558_v55 = vadd.f32 %v557_v54, %v2185_v24  ;;  %v559_v56 = vpop.f32.mrb[10].mxu0  ;;  %965 = vmatprep.mubr.bf16.mxu1 %v761_v51 }
 0x1a1   : > { %v560_v57 = vadd.f32 %v559_v56, %v2183_v23  ;;  %v561_v58 = vpop.f32.mrb[11].mxu0  ;;  %966 = vmatmul.mubr.bf16.gmra.mrb[4].mxu1 %v760_v50  ;;  %v702_v60 = vmax.f32 %v556_v53, 0.0 }
 0x1a2   : > { %v562_v59 = vadd.f32 %v561_v58, %v2185_v24  ;;  %v703_v62 = vmax.f32 %v558_v55, 0.0 }
 0x1a3   : > { %v704_v61 = vmax.f32 %v560_v57, 0.0 }
 0x1a4   : > { %v705_v63 = vmax.f32 %v562_v59, 0.0 }
 0x1a5   : > { %v762_v1 = vpack.c.bf16 %v704_v61, %v702_v60 }
 0x1a6   : > { %v763_v2 = vpack.c.bf16 %v705_v63, %v703_v62  ;;  %v565_v3 = vpop.f32.mrb[12].mxu0 }
 0x1a7   : > { %v566_v4 = vadd.f32 %v565_v3, %v2183_v23  ;;  %v567_v5 = vpop.f32.mrb[13].mxu0 }
 0x1a8   : > { %v568_v6 = vadd.f32 %v567_v5, %v2185_v24  ;;  %v569_v7 = vpop.f32.mrb[14].mxu0  ;;  %973 = vmatprep.mubr.bf16.mxu1 %v763_v2 }
 0x1a9   : > { %v570_v8 = vadd.f32 %v569_v7, %v2183_v23  ;;  %v571_v9 = vpop.f32.mrb[15].mxu0  ;;  %974 = vmatmul.mubr.bf16.gmra.mrb[8].mxu1 %v762_v1  ;;  %v706_v11 = vmax.f32 %v566_v4, 0.0 }
 0x1aa   : > { %v572_v10 = vadd.f32 %v571_v9, %v2185_v24  ;;  %v707_v13 = vmax.f32 %v568_v6, 0.0 }
 0x1ab   : > { %v708_v12 = vmax.f32 %v570_v8, 0.0 }
 0x1ac   : > { %v709_v14 = vmax.f32 %v572_v10, 0.0 }
 0x1ad   : > { %v764_v15 = vpack.c.bf16 %v708_v12, %v706_v11 }
 0x1ae   : > { %v765_v16 = vpack.c.bf16 %v709_v14, %v707_v13  ;;  %v575_v17 = vpop.f32.mrb[16].mxu0 }
 0x1af   : > { %v576_v18 = vadd.f32 %v575_v17, %v2183_v23  ;;  %v577_v19 = vpop.f32.mrb[17].mxu0 }
 0x1b0   : > { %v578_v20 = vadd.f32 %v577_v19, %v2185_v24  ;;  %v579_v21 = vpop.f32.mrb[18].mxu0  ;;  %981 = vmatprep.mubr.bf16.mxu1 %v765_v16 }
 0x1b1   : > { %v580_v22 = vadd.f32 %v579_v21, %v2183_v23  ;;  %v581_v25 = vpop.f32.mrb[19].mxu0  ;;  %982 = vmatmul.mubr.bf16.gmra.mrb[12].mxu1 %v764_v15  ;;  %v710_v0 = vmax.f32 %v576_v18, 0.0 }
 0x1b2   : > { %v582_v26 = vadd.f32 %v581_v25, %v2185_v24  ;;  %v711_v28 = vmax.f32 %v578_v20, 0.0 }
 0x1b3   : > { %v712_v27 = vmax.f32 %v580_v22, 0.0 }
 0x1b4   : > { %v713_v29 = vmax.f32 %v582_v26, 0.0 }
 0x1b5   : > { %v766_v30 = vpack.c.bf16 %v712_v27, %v710_v0 }
 0x1b6   : > { %v767_v31 = vpack.c.bf16 %v713_v29, %v711_v28  ;;  %v585_v32 = vpop.f32.mrb[20].mxu0 }
 0x1b7   : > { %v586_v33 = vadd.f32 %v585_v32, %v2183_v23  ;;  %v587_v34 = vpop.f32.mrb[21].mxu0 }
 0x1b8   : > { %v588_v35 = vadd.f32 %v587_v34, %v2185_v24  ;;  %v589_v36 = vpop.f32.mrb[22].mxu0  ;;  %989 = vmatprep.mubr.bf16.mxu1 %v767_v31 }
 0x1b9   : > { %v590_v37 = vadd.f32 %v589_v36, %v2183_v23  ;;  %v591_v38 = vpop.f32.mrb[23].mxu0  ;;  %990 = vmatmul.mubr.bf16.gmra.mrb[16].mxu1 %v766_v30  ;;  %v714_v40 = vmax.f32 %v586_v33, 0.0 }
 0x1ba   : > { %v592_v39 = vadd.f32 %v591_v38, %v2185_v24  ;;  %v715_v42 = vmax.f32 %v588_v35, 0.0 }
 0x1bb   : > { %v716_v41 = vmax.f32 %v590_v37, 0.0 }
 0x1bc   : > { %v717_v43 = vmax.f32 %v592_v39, 0.0 }
 0x1bd   : > { %v768_v44 = vpack.c.bf16 %v716_v41, %v714_v40 }
 0x1be   : > { %v769_v45 = vpack.c.bf16 %v717_v43, %v715_v42  ;;  %v595_v46 = vpop.f32.mrb[24].mxu0 }
 0x1bf   : > { %v596_v47 = vadd.f32 %v595_v46, %v2183_v23  ;;  %v597_v48 = vpop.f32.mrb[25].mxu0 }
 0x1c0   : > { %v598_v49 = vadd.f32 %v597_v48, %v2185_v24  ;;  %v599_v50 = vpop.f32.mrb[26].mxu0  ;;  %997 = vmatprep.mubr.bf16.mxu1 %v769_v45 }
 0x1c1   : > { %v600_v51 = vadd.f32 %v599_v50, %v2183_v23  ;;  %v601_v52 = vpop.f32.mrb[27].mxu0  ;;  %998 = vmatmul.mubr.bf16.gmra.mrb[20].mxu1 %v768_v44  ;;  %v718_v54 = vmax.f32 %v596_v47, 0.0 }
 0x1c2   : > { %v602_v53 = vadd.f32 %v601_v52, %v2185_v24  ;;  %v719_v56 = vmax.f32 %v598_v49, 0.0 }
 0x1c3   : > { %v720_v55 = vmax.f32 %v600_v51, 0.0 }
 0x1c4   : > { %v721_v57 = vmax.f32 %v602_v53, 0.0 }
 0x1c5   : > { %v770_v58 = vpack.c.bf16 %v720_v55, %v718_v54 }
 0x1c6   : > { %v771_v59 = vpack.c.bf16 %v721_v57, %v719_v56  ;;  %v605_v60 = vpop.f32.mrb[28].mxu0 }
 0x1c7   : > { %v606_v61 = vadd.f32 %v605_v60, %v2183_v23  ;;  %v607_v62 = vpop.f32.mrb[29].mxu0 }
 0x1c8   : > { %v608_v63 = vadd.f32 %v607_v62, %v2185_v24  ;;  %v609_v1 = vpop.f32.mrb[30].mxu0  ;;  %1005 = vmatprep.mubr.bf16.mxu1 %v771_v59 }
 0x1c9   : > { %v610_v2 = vadd.f32 %v609_v1, %v2183_v23  ;;  %v611_v3 = vpop.f32.mrb[31].mxu0  ;;  %1006 = vmatmul.mubr.bf16.gmra.mrb[24].mxu1 %v770_v58  ;;  %v722_v5 = vmax.f32 %v606_v61, 0.0 }
 0x1ca   : > { %v612_v4 = vadd.f32 %v611_v3, %v2185_v24  ;;  %v723_v7 = vmax.f32 %v608_v63, 0.0 }
 0x1cb   : > { %v724_v6 = vmax.f32 %v610_v2, 0.0 }
 0x1cc   : > { %v725_v8 = vmax.f32 %v612_v4, 0.0 }
 0x1cd   : > { %v772_v9 = vpack.c.bf16 %v724_v6, %v722_v5 }
 0x1ce   : > { %v773_v10 = vpack.c.bf16 %v725_v8, %v723_v7  ;;  %v615_v11 = vpop.f32.mrb[32].mxu0 }
 0x1cf   : > { %v616_v12 = vadd.f32 %v615_v11, %v2183_v23  ;;  %v617_v13 = vpop.f32.mrb[33].mxu0 }
 0x1d0   : > { %v618_v14 = vadd.f32 %v617_v13, %v2185_v24  ;;  %v619_v15 = vpop.f32.mrb[34].mxu0  ;;  %1013 = vmatprep.mubr.bf16.mxu1 %v773_v10 }
 0x1d1   : > { %v620_v16 = vadd.f32 %v619_v15, %v2183_v23  ;;  %v621_v17 = vpop.f32.mrb[35].mxu0  ;;  %1014 = vmatmul.mubr.bf16.gmra.mrb[28].mxu1 %v772_v9  ;;  %v726_v19 = vmax.f32 %v616_v12, 0.0 }
 0x1d2   : > { %v622_v18 = vadd.f32 %v621_v17, %v2185_v24  ;;  %v727_v21 = vmax.f32 %v618_v14, 0.0 }
 0x1d3   : > { %v728_v20 = vmax.f32 %v620_v16, 0.0 }
 0x1d4   : > { %v729_v22 = vmax.f32 %v622_v18, 0.0 }
 0x1d5   : > { %v774_v25 = vpack.c.bf16 %v728_v20, %v726_v19 }
 0x1d6   : > { %v775_v26 = vpack.c.bf16 %v729_v22, %v727_v21  ;;  %v625_v0 = vpop.f32.mrb[36].mxu0 }
 0x1d7   : > { %v626_v27 = vadd.f32 %v625_v0, %v2183_v23  ;;  %v627_v28 = vpop.f32.mrb[37].mxu0 }
 0x1d8   : > { %v628_v29 = vadd.f32 %v627_v28, %v2185_v24  ;;  %v629_v30 = vpop.f32.mrb[38].mxu0  ;;  %1021 = vmatprep.mubr.bf16.mxu1 %v775_v26 }
 0x1d9   : > { %v630_v31 = vadd.f32 %v629_v30, %v2183_v23  ;;  %v631_v32 = vpop.f32.mrb[39].mxu0  ;;  %1022 = vmatmul.mubr.bf16.gmra.mrb[32].mxu1 %v774_v25  ;;  %v730_v34 = vmax.f32 %v626_v27, 0.0 }
 0x1da   : > { %v632_v33 = vadd.f32 %v631_v32, %v2185_v24  ;;  %v731_v36 = vmax.f32 %v628_v29, 0.0 }
 0x1db   : > { %v732_v35 = vmax.f32 %v630_v31, 0.0 }
 0x1dc   : > { %v733_v37 = vmax.f32 %v632_v33, 0.0 }
 0x1dd   : > { %v776_v38 = vpack.c.bf16 %v732_v35, %v730_v34 }
 0x1de   : > { %v777_v39 = vpack.c.bf16 %v733_v37, %v731_v36  ;;  %v635_v40 = vpop.f32.mrb[40].mxu0 }
 0x1df   : > { %v636_v41 = vadd.f32 %v635_v40, %v2183_v23  ;;  %v637_v42 = vpop.f32.mrb[41].mxu0 }
 0x1e0   : > { %v638_v43 = vadd.f32 %v637_v42, %v2185_v24  ;;  %v639_v44 = vpop.f32.mrb[42].mxu0  ;;  %1029 = vmatprep.mubr.bf16.mxu1 %v777_v39 }
 0x1e1   : > { %v640_v45 = vadd.f32 %v639_v44, %v2183_v23  ;;  %v641_v46 = vpop.f32.mrb[43].mxu0  ;;  %1030 = vmatmul.mubr.bf16.gmra.mrb[36].mxu1 %v776_v38  ;;  %v734_v48 = vmax.f32 %v636_v41, 0.0 }
 0x1e2   : > { %v642_v47 = vadd.f32 %v641_v46, %v2185_v24  ;;  %v735_v50 = vmax.f32 %v638_v43, 0.0 }
 0x1e3   : > { %v736_v49 = vmax.f32 %v640_v45, 0.0 }
 0x1e4   : > { %v737_v51 = vmax.f32 %v642_v47, 0.0 }
 0x1e5   : > { %v778_v52 = vpack.c.bf16 %v736_v49, %v734_v48 }
 0x1e6   : > { %v779_v53 = vpack.c.bf16 %v737_v51, %v735_v50  ;;  %v645_v54 = vpop.f32.mrb[44].mxu0 }
 0x1e7   : > { %v646_v55 = vadd.f32 %v645_v54, %v2183_v23  ;;  %v647_v56 = vpop.f32.mrb[45].mxu0 }
 0x1e8   : > { %v648_v57 = vadd.f32 %v647_v56, %v2185_v24  ;;  %v649_v58 = vpop.f32.mrb[46].mxu0  ;;  %1037 = vmatprep.mubr.bf16.mxu1 %v779_v53 }
 0x1e9   : > { %v650_v59 = vadd.f32 %v649_v58, %v2183_v23  ;;  %v651_v60 = vpop.f32.mrb[47].mxu0  ;;  %1038 = vmatmul.mubr.bf16.gmra.mrb[40].mxu1 %v778_v52  ;;  %v738_v62 = vmax.f32 %v646_v55, 0.0 }
 0x1ea   : > { %v652_v61 = vadd.f32 %v651_v60, %v2185_v24  ;;  %v739_v1 = vmax.f32 %v648_v57, 0.0 }
 0x1eb   : > { %v740_v63 = vmax.f32 %v650_v59, 0.0 }
 0x1ec   : > { %v741_v2 = vmax.f32 %v652_v61, 0.0 }
 0x1ed   : > { %v780_v3 = vpack.c.bf16 %v740_v63, %v738_v62 }
 0x1ee   : > { %v781_v4 = vpack.c.bf16 %v741_v2, %v739_v1  ;;  %v655_v5 = vpop.f32.mrb[48].mxu0  ;;  %v2256_v2 = vstv %s1118_s23 }
 0x1ef   : > { %v656_v6 = vadd.f32 %v655_v5, %v2183_v23  ;;  %v657_v7 = vpop.f32.mrb[49].mxu0 }
 0x1f0   : > { %v658_v8 = vadd.f32 %v657_v7, %v2185_v24  ;;  %v659_v9 = vpop.f32.mrb[50].mxu0  ;;  %1045 = vmatprep.mubr.bf16.mxu1 %v781_v4 }
 0x1f1   : > { %v660_v10 = vadd.f32 %v659_v9, %v2183_v23  ;;  %v661_v11 = vpop.f32.mrb[51].mxu0  ;;  %1046 = vmatmul.mubr.bf16.gmra.mrb[44].mxu1 %v780_v3  ;;  %v742_v13 = vmax.f32 %v656_v6, 0.0  ;;  %v1086_v6 = vld [vmem:[%s2118_s21] sm:$0xff]  ;;  %v1087_v9 = vld [vmem:[%s2118_s21 + $0x8] sm:$0xff] }
 0x1f2   : > { %v662_v12 = vadd.f32 %v661_v11, %v2185_v24  ;;  %v743_v15 = vmax.f32 %v658_v8, 0.0 }
 0x1f3   : > { %v744_v14 = vmax.f32 %v660_v10, 0.0 }
 0x1f4   : > { %v745_v16 = vmax.f32 %v662_v12, 0.0 }
 0x1f5   : > { %v782_v17 = vpack.c.bf16 %v744_v14, %v742_v13 }
 0x1f6   : > { %v783_v18 = vpack.c.bf16 %v745_v16, %v743_v15  ;;  %v665_v19 = vpop.f32.mrb[52].mxu0 }
 0x1f7   : > { %v666_v20 = vadd.f32 %v665_v19, %v2183_v23  ;;  %v667_v21 = vpop.f32.mrb[53].mxu0 }
 0x1f8   : > { %v668_v22 = vadd.f32 %v667_v21, %v2185_v24  ;;  %v669_v25 = vpop.f32.mrb[54].mxu0  ;;  %1053 = vmatprep.mubr.bf16.mxu1 %v783_v18 }
 0x1f9   : > { %v670_v26 = vadd.f32 %v669_v25, %v2183_v23  ;;  %v671_v0 = vpop.f32.mrb[55].mxu0  ;;  %1054 = vmatmul.mubr.bf16.gmra.mrb[48].mxu1 %v782_v17  ;;  %v746_v28 = vmax.f32 %v666_v20, 0.0  ;;  %v1088_v20 = vld [vmem:[%s2118_s21 + $0x10] sm:$0xff]  ;;  %v1089_v25 = vld [vmem:[%s2118_s21 + $0x18] sm:$0xff] }
 0x1fa   : > { %v672_v27 = vadd.f32 %v671_v0, %v2185_v24  ;;  %v747_v30 = vmax.f32 %v668_v22, 0.0 }
 0x1fb   : > { %v748_v29 = vmax.f32 %v670_v26, 0.0 }
 0x1fc   : > { %v749_v31 = vmax.f32 %v672_v27, 0.0 }
 0x1fd   : > { %v784_v32 = vpack.c.bf16 %v748_v29, %v746_v28 }
 0x1fe   : > { %v785_v33 = vpack.c.bf16 %v749_v31, %v747_v30  ;;  %v675_v34 = vpop.f32.mrb[56].mxu0 }
 0x1ff   : > { %v676_v35 = vadd.f32 %v675_v34, %v2183_v23  ;;  %v677_v36 = vpop.f32.mrb[57].mxu0 }
 0x200   : > { %v678_v37 = vadd.f32 %v677_v36, %v2185_v24  ;;  %v679_v38 = vpop.f32.mrb[58].mxu0  ;;  %1061 = vmatprep.mubr.bf16.mxu1 %v785_v33 }
 0x201   : > { %v680_v39 = vadd.f32 %v679_v38, %v2183_v23  ;;  %v681_v40 = vpop.f32.mrb[59].mxu0  ;;  %1062 = vmatmul.mubr.bf16.gmra.mrb[52].mxu1 %v784_v32  ;;  %v750_v42 = vmax.f32 %v676_v35, 0.0  ;;  %v1090_v35 = vld [vmem:[%s2118_s21 + $0x20] sm:$0xff]  ;;  %v1091_v38 = vld [vmem:[%s2118_s21 + $0x28] sm:$0xff] }
 0x202   : > { %v682_v41 = vadd.f32 %v681_v40, %v2185_v24  ;;  %v751_v44 = vmax.f32 %v678_v37, 0.0 }
 0x203   : > { %v752_v43 = vmax.f32 %v680_v39, 0.0 }
 0x204   : > { %v753_v45 = vmax.f32 %v682_v41, 0.0 }
 0x205   : > { %v786_v46 = vpack.c.bf16 %v752_v43, %v750_v42 }
 0x206   : > { %v787_v47 = vpack.c.bf16 %v753_v45, %v751_v44  ;;  %v685_v48 = vpop.f32.mrb[60].mxu0 }
 0x207   : > { %v686_v49 = vadd.f32 %v685_v48, %v2183_v23  ;;  %v687_v50 = vpop.f32.mrb[61].mxu0 }
 0x208   : > { %v688_v51 = vadd.f32 %v687_v50, %v2185_v24  ;;  %v689_v52 = vpop.f32.mrb[62].mxu0  ;;  %1069 = vmatprep.mubr.bf16.mxu1 %v787_v47 }
 0x209   : > { %v690_v53 = vadd.f32 %v689_v52, %v2183_v23  ;;  %v691_v54 = vpop.f32.mrb[63].mxu0  ;;  %1070 = vmatmul.mubr.bf16.gmra.mrb[56].mxu1 %v786_v46  ;;  %v754_v56 = vmax.f32 %v686_v49, 0.0  ;;  %v2254_v23 = vld [vmem:[%s2446_s6] ss:$0 sm:$0xff]  ;;  %v1092_v49 = vld [vmem:[%s2118_s21 + $0x30] sm:$0xff]  ;;  %v1093_v52 = vld [vmem:[%s2118_s21 + $0x38] sm:$0xff] }
 0x20a   : > { %v692_v55 = vadd.f32 %v691_v54, %v2185_v24  ;;  %v755_v58 = vmax.f32 %v688_v51, 0.0 }
 0x20b   : > { %v756_v57 = vmax.f32 %v690_v53, 0.0 }
 0x20c   : > { %v757_v59 = vmax.f32 %v692_v55, 0.0 }
 0x20d   : > { %v788_v60 = vpack.c.bf16 %v756_v57, %v754_v56 }
 0x20e   : > { %v789_v61 = vpack.c.bf16 %v757_v59, %v755_v58 }
 0x210   : > { %1077 = vmatprep.mubr.bf16.mxu1 %v789_v61 }
 0x211   : > { %1078 = vmatmul.mubr.bf16.gmra.mrb[60].mxu1 %v788_v60 }
 0x26c   : > { %v1419_v62 = vpop.f32.mrb[0].mxu1 }
 0x26d   : > { %v1420_v63 = vpop.f32.mrb[1].mxu1 }
 0x26e   : > { %v1421_v24 = vadd.f32 %v1420_v63, %v1419_v62  ;;  %v1422_v1 = vpop.f32.mrb[2].mxu1  ;;  %v1094_v63 = vld [vmem:[%s2118_s21 + $0x40] sm:$0xff] }
 0x26f   : > { %v1423_v3 = vpop.f32.mrb[3].mxu1 }
 0x270   : > { %v960_v4 = vadd.f32 %v1421_v24, %v2254_v23  ;;  %v1424_v5 = vadd.f32 %v1423_v3, %v1422_v1  ;;  %v1095_v3 = vld [vmem:[%s2118_s21 + $0x48] sm:$0xff] }
 0x272   : > { %v1120_v7 = vmul.f32 %v2256_v2, %v960_v4  ;;  %v963_v8 = vadd.f32 %v1424_v5, %v2254_v23 }
 0x274   : > { %v1152_v10 = vmax.f32 %v1086_v6, %v1120_v7  ;;  %v1121_v11 = vmul.f32 %v2256_v2, %v963_v8  ;;  %v1425_v12 = vpop.f32.mrb[4].mxu1 }
 0x275   : > { %v1426_v13 = vpop.f32.mrb[5].mxu1 }
 0x276   : > { %1184 = vst [vmem:[%s2265_s5] sm:$0xff] %v1152_v10  ;;  %v1153_v14 = vmax.f32 %v1087_v9, %v1121_v11  ;;  %v1427_v15 = vadd.f32 %v1426_v13, %v1425_v12  ;;  %v1428_v16 = vpop.f32.mrb[6].mxu1 }
 0x277   : > { %v1429_v17 = vpop.f32.mrb[7].mxu1 }
 0x278   : > { %1185 = vst [vmem:[%s2265_s5 + $0x8] sm:$0xff] %v1153_v14  ;;  %v968_v18 = vadd.f32 %v1427_v15, %v2254_v23  ;;  %v1430_v19 = vadd.f32 %v1429_v17, %v1428_v16  ;;  %v1096_v14 = vld [vmem:[%s2118_s21 + $0x50] sm:$0xff]  ;;  %v1097_v17 = vld [vmem:[%s2118_s21 + $0x58] sm:$0xff] }
 0x27a   : > { %v1122_v21 = vmul.f32 %v2256_v2, %v968_v18  ;;  %v971_v22 = vadd.f32 %v1430_v19, %v2254_v23 }
 0x27c   : > { %v1154_v26 = vmax.f32 %v1088_v20, %v1122_v21  ;;  %v1123_v0 = vmul.f32 %v2256_v2, %v971_v22  ;;  %v1431_v27 = vpop.f32.mrb[8].mxu1 }
 0x27d   : > { %v1432_v28 = vpop.f32.mrb[9].mxu1 }
 0x27e   : > { %1186 = vst [vmem:[%s2265_s5 + $0x10] sm:$0xff] %v1154_v26  ;;  %v1155_v29 = vmax.f32 %v1089_v25, %v1123_v0  ;;  %v1433_v30 = vadd.f32 %v1432_v28, %v1431_v27  ;;  %v1434_v31 = vpop.f32.mrb[10].mxu1 }
 0x27f   : > { %v1435_v32 = vpop.f32.mrb[11].mxu1 }
 0x280   : > { %1187 = vst [vmem:[%s2265_s5 + $0x18] sm:$0xff] %v1155_v29  ;;  %v976_v33 = vadd.f32 %v1433_v30, %v2254_v23  ;;  %v1436_v34 = vadd.f32 %v1435_v32, %v1434_v31  ;;  %v1098_v29 = vld [vmem:[%s2118_s21 + $0x60] sm:$0xff]  ;;  %v1099_v32 = vld [vmem:[%s2118_s21 + $0x68] sm:$0xff] }
 0x282   : > { %v1124_v36 = vmul.f32 %v2256_v2, %v976_v33  ;;  %v979_v37 = vadd.f32 %v1436_v34, %v2254_v23 }
 0x284   : > { %v1156_v39 = vmax.f32 %v1090_v35, %v1124_v36  ;;  %v1125_v40 = vmul.f32 %v2256_v2, %v979_v37  ;;  %v1437_v41 = vpop.f32.mrb[12].mxu1 }
 0x285   : > { %v1438_v42 = vpop.f32.mrb[13].mxu1 }
 0x286   : > { %1188 = vst [vmem:[%s2265_s5 + $0x20] sm:$0xff] %v1156_v39  ;;  %v1157_v43 = vmax.f32 %v1091_v38, %v1125_v40  ;;  %v1439_v44 = vadd.f32 %v1438_v42, %v1437_v41  ;;  %v1440_v45 = vpop.f32.mrb[14].mxu1 }
 0x287   : > { %v1441_v46 = vpop.f32.mrb[15].mxu1 }
 0x288   : > { %1189 = vst [vmem:[%s2265_s5 + $0x28] sm:$0xff] %v1157_v43  ;;  %v984_v47 = vadd.f32 %v1439_v44, %v2254_v23  ;;  %v1442_v48 = vadd.f32 %v1441_v46, %v1440_v45  ;;  %v1100_v43 = vld [vmem:[%s2118_s21 + $0x70] sm:$0xff]  ;;  %v1101_v46 = vld [vmem:[%s2118_s21 + $0x78] sm:$0xff] }
 0x28a   : > { %v1126_v50 = vmul.f32 %v2256_v2, %v984_v47  ;;  %v987_v51 = vadd.f32 %v1442_v48, %v2254_v23 }
 0x28c   : > { %v1158_v53 = vmax.f32 %v1092_v49, %v1126_v50  ;;  %v1127_v54 = vmul.f32 %v2256_v2, %v987_v51  ;;  %v1443_v55 = vpop.f32.mrb[16].mxu1 }
 0x28d   : > { %v1444_v56 = vpop.f32.mrb[17].mxu1 }
 0x28e   : > { %1190 = vst [vmem:[%s2265_s5 + $0x30] sm:$0xff] %v1158_v53  ;;  %v1159_v57 = vmax.f32 %v1093_v52, %v1127_v54  ;;  %v1445_v58 = vadd.f32 %v1444_v56, %v1443_v55  ;;  %v1446_v59 = vpop.f32.mrb[18].mxu1 }
 0x28f   : > { %v1447_v60 = vpop.f32.mrb[19].mxu1 }
 0x290   : > { %1191 = vst [vmem:[%s2265_s5 + $0x38] sm:$0xff] %v1159_v57  ;;  %v992_v61 = vadd.f32 %v1445_v58, %v2254_v23  ;;  %v1448_v62 = vadd.f32 %v1447_v60, %v1446_v59  ;;  %v1102_v57 = vld [vmem:[%s2118_s21 + $0x80] sm:$0xff]  ;;  %v1103_v60 = vld [vmem:[%s2118_s21 + $0x88] sm:$0xff] }
 0x292   : > { %v1128_v24 = vmul.f32 %v2256_v2, %v992_v61  ;;  %v995_v1 = vadd.f32 %v1448_v62, %v2254_v23 }
 0x294   : > { %v1160_v4 = vmax.f32 %v1094_v63, %v1128_v24  ;;  %v1129_v5 = vmul.f32 %v2256_v2, %v995_v1  ;;  %v1449_v6 = vpop.f32.mrb[20].mxu1 }
 0x295   : > { %v1450_v7 = vpop.f32.mrb[21].mxu1 }
 0x296   : > { %1192 = vst [vmem:[%s2265_s5 + $0x40] sm:$0xff] %v1160_v4  ;;  %v1161_v8 = vmax.f32 %v1095_v3, %v1129_v5  ;;  %v1451_v9 = vadd.f32 %v1450_v7, %v1449_v6  ;;  %v1452_v10 = vpop.f32.mrb[22].mxu1 }
 0x297   : > { %v1453_v11 = vpop.f32.mrb[23].mxu1 }
 0x298   : > { %1193 = vst [vmem:[%s2265_s5 + $0x48] sm:$0xff] %v1161_v8  ;;  %v1000_v12 = vadd.f32 %v1451_v9, %v2254_v23  ;;  %v1454_v13 = vadd.f32 %v1453_v11, %v1452_v10  ;;  %v1104_v8 = vld [vmem:[%s2118_s21 + $0x90] sm:$0xff]  ;;  %v1105_v11 = vld [vmem:[%s2118_s21 + $0x98] sm:$0xff] }
 0x29a   : > { %v1130_v15 = vmul.f32 %v2256_v2, %v1000_v12  ;;  %v1003_v16 = vadd.f32 %v1454_v13, %v2254_v23 }
 0x29c   : > { %v1162_v18 = vmax.f32 %v1096_v14, %v1130_v15  ;;  %v1131_v19 = vmul.f32 %v2256_v2, %v1003_v16  ;;  %v1455_v20 = vpop.f32.mrb[24].mxu1 }
 0x29d   : > { %v1456_v21 = vpop.f32.mrb[25].mxu1 }
 0x29e   : > { %1194 = vst [vmem:[%s2265_s5 + $0x50] sm:$0xff] %v1162_v18  ;;  %v1163_v22 = vmax.f32 %v1097_v17, %v1131_v19  ;;  %v1457_v25 = vadd.f32 %v1456_v21, %v1455_v20  ;;  %v1458_v26 = vpop.f32.mrb[26].mxu1 }
 0x29f   : > { %v1459_v0 = vpop.f32.mrb[27].mxu1 }
 0x2a0   : > { %1195 = vst [vmem:[%s2265_s5 + $0x58] sm:$0xff] %v1163_v22  ;;  %v1008_v27 = vadd.f32 %v1457_v25, %v2254_v23  ;;  %v1460_v28 = vadd.f32 %v1459_v0, %v1458_v26  ;;  %v1106_v22 = vld [vmem:[%s2118_s21 + $0xa0] sm:$0xff]  ;;  %v1107_v0 = vld [vmem:[%s2118_s21 + $0xa8] sm:$0xff] }
 0x2a2   : > { %v1132_v30 = vmul.f32 %v2256_v2, %v1008_v27  ;;  %v1011_v31 = vadd.f32 %v1460_v28, %v2254_v23 }
 0x2a4   : > { %v1164_v33 = vmax.f32 %v1098_v29, %v1132_v30  ;;  %v1133_v34 = vmul.f32 %v2256_v2, %v1011_v31  ;;  %v1461_v35 = vpop.f32.mrb[28].mxu1 }
 0x2a5   : > { %v1462_v36 = vpop.f32.mrb[29].mxu1 }
 0x2a6   : > { %1196 = vst [vmem:[%s2265_s5 + $0x60] sm:$0xff] %v1164_v33  ;;  %v1165_v37 = vmax.f32 %v1099_v32, %v1133_v34  ;;  %v1463_v38 = vadd.f32 %v1462_v36, %v1461_v35  ;;  %v1464_v39 = vpop.f32.mrb[30].mxu1 }
 0x2a7   : > { %v1465_v40 = vpop.f32.mrb[31].mxu1 }
 0x2a8   : > { %1197 = vst [vmem:[%s2265_s5 + $0x68] sm:$0xff] %v1165_v37  ;;  %v1016_v41 = vadd.f32 %v1463_v38, %v2254_v23  ;;  %v1466_v42 = vadd.f32 %v1465_v40, %v1464_v39  ;;  %v1108_v37 = vld [vmem:[%s2118_s21 + $0xb0] sm:$0xff]  ;;  %v1109_v40 = vld [vmem:[%s2118_s21 + $0xb8] sm:$0xff] }
 0x2aa   : > { %v1134_v44 = vmul.f32 %v2256_v2, %v1016_v41  ;;  %v1019_v45 = vadd.f32 %v1466_v42, %v2254_v23 }
 0x2ac   : > { %v1166_v47 = vmax.f32 %v1100_v43, %v1134_v44  ;;  %v1135_v48 = vmul.f32 %v2256_v2, %v1019_v45  ;;  %v1467_v49 = vpop.f32.mrb[32].mxu1 }
 0x2ad   : > { %v1468_v50 = vpop.f32.mrb[33].mxu1 }
 0x2ae   : > { %1198 = vst [vmem:[%s2265_s5 + $0x70] sm:$0xff] %v1166_v47  ;;  %v1167_v51 = vmax.f32 %v1101_v46, %v1135_v48  ;;  %v1469_v52 = vadd.f32 %v1468_v50, %v1467_v49  ;;  %v1470_v53 = vpop.f32.mrb[34].mxu1 }
 0x2af   : > { %v1471_v54 = vpop.f32.mrb[35].mxu1 }
 0x2b0   : > { %1199 = vst [vmem:[%s2265_s5 + $0x78] sm:$0xff] %v1167_v51  ;;  %v1024_v55 = vadd.f32 %v1469_v52, %v2254_v23  ;;  %v1472_v56 = vadd.f32 %v1471_v54, %v1470_v53  ;;  %v1110_v51 = vld [vmem:[%s2118_s21 + $0xc0] sm:$0xff]  ;;  %v1111_v54 = vld [vmem:[%s2118_s21 + $0xc8] sm:$0xff] }
 0x2b2   : > { %v1136_v58 = vmul.f32 %v2256_v2, %v1024_v55  ;;  %v1027_v59 = vadd.f32 %v1472_v56, %v2254_v23 }
 0x2b4   : > { %v1168_v61 = vmax.f32 %v1102_v57, %v1136_v58  ;;  %v1137_v62 = vmul.f32 %v2256_v2, %v1027_v59  ;;  %v1473_v63 = vpop.f32.mrb[36].mxu1 }
 0x2b5   : > { %v1474_v24 = vpop.f32.mrb[37].mxu1 }
 0x2b6   : > { %1200 = vst [vmem:[%s2265_s5 + $0x80] sm:$0xff] %v1168_v61  ;;  %v1169_v1 = vmax.f32 %v1103_v60, %v1137_v62  ;;  %v1475_v3 = vadd.f32 %v1474_v24, %v1473_v63  ;;  %v1476_v4 = vpop.f32.mrb[38].mxu1 }
 0x2b7   : > { %v1477_v5 = vpop.f32.mrb[39].mxu1 }
 0x2b8   : > { %1201 = vst [vmem:[%s2265_s5 + $0x88] sm:$0xff] %v1169_v1  ;;  %v1032_v6 = vadd.f32 %v1475_v3, %v2254_v23  ;;  %v1478_v7 = vadd.f32 %v1477_v5, %v1476_v4  ;;  %v1112_v1 = vld [vmem:[%s2118_s21 + $0xd0] sm:$0xff]  ;;  %v1113_v5 = vld [vmem:[%s2118_s21 + $0xd8] sm:$0xff] }
 0x2ba   : > { %v1138_v9 = vmul.f32 %v2256_v2, %v1032_v6  ;;  %v1035_v10 = vadd.f32 %v1478_v7, %v2254_v23 }
 0x2bc   : > { %v1170_v12 = vmax.f32 %v1104_v8, %v1138_v9  ;;  %v1139_v13 = vmul.f32 %v2256_v2, %v1035_v10  ;;  %v1479_v14 = vpop.f32.mrb[40].mxu1 }
 0x2bd   : > { %v1480_v15 = vpop.f32.mrb[41].mxu1 }
 0x2be   : > { %1202 = vst [vmem:[%s2265_s5 + $0x90] sm:$0xff] %v1170_v12  ;;  %v1171_v16 = vmax.f32 %v1105_v11, %v1139_v13  ;;  %v1481_v17 = vadd.f32 %v1480_v15, %v1479_v14  ;;  %v1482_v18 = vpop.f32.mrb[42].mxu1 }
 0x2bf   : > { %v1483_v19 = vpop.f32.mrb[43].mxu1 }
 0x2c0   : > { %1203 = vst [vmem:[%s2265_s5 + $0x98] sm:$0xff] %v1171_v16  ;;  %v1040_v20 = vadd.f32 %v1481_v17, %v2254_v23  ;;  %v1484_v21 = vadd.f32 %v1483_v19, %v1482_v18  ;;  %v1114_v16 = vld [vmem:[%s2118_s21 + $0xe0] sm:$0xff]  ;;  %v1115_v19 = vld [vmem:[%s2118_s21 + $0xe8] sm:$0xff] }
 0x2c2   : > { %v1140_v25 = vmul.f32 %v2256_v2, %v1040_v20  ;;  %v1043_v26 = vadd.f32 %v1484_v21, %v2254_v23 }
 0x2c4   : > { %v1172_v27 = vmax.f32 %v1106_v22, %v1140_v25  ;;  %v1141_v28 = vmul.f32 %v2256_v2, %v1043_v26  ;;  %v1485_v29 = vpop.f32.mrb[44].mxu1 }
 0x2c5   : > { %v1486_v30 = vpop.f32.mrb[45].mxu1 }
 0x2c6   : > { %1204 = vst [vmem:[%s2265_s5 + $0xa0] sm:$0xff] %v1172_v27  ;;  %v1173_v31 = vmax.f32 %v1107_v0, %v1141_v28  ;;  %v1487_v32 = vadd.f32 %v1486_v30, %v1485_v29  ;;  %v1488_v33 = vpop.f32.mrb[46].mxu1 }
 0x2c7   : > { %v1489_v34 = vpop.f32.mrb[47].mxu1 }
 0x2c8   : > { %1205 = vst [vmem:[%s2265_s5 + $0xa8] sm:$0xff] %v1173_v31  ;;  %v1048_v35 = vadd.f32 %v1487_v32, %v2254_v23  ;;  %v1490_v36 = vadd.f32 %v1489_v34, %v1488_v33  ;;  %v1116_v31 = vld [vmem:[%s2118_s21 + $0xf0] sm:$0xff]  ;;  %v1117_v34 = vld [vmem:[%s2118_s21 + $0xf8] sm:$0xff] }
 0x2ca   : > { %v1142_v38 = vmul.f32 %v2256_v2, %v1048_v35  ;;  %v1051_v39 = vadd.f32 %v1490_v36, %v2254_v23 }
 0x2cc   : > { %v1174_v41 = vmax.f32 %v1108_v37, %v1142_v38  ;;  %v1143_v42 = vmul.f32 %v2256_v2, %v1051_v39  ;;  %v1491_v43 = vpop.f32.mrb[48].mxu1 }
 0x2cd   : > { %v1492_v44 = vpop.f32.mrb[49].mxu1 }
 0x2ce   : > { %1206 = vst [vmem:[%s2265_s5 + $0xb0] sm:$0xff] %v1174_v41  ;;  %v1175_v45 = vmax.f32 %v1109_v40, %v1143_v42  ;;  %v1493_v46 = vadd.f32 %v1492_v44, %v1491_v43  ;;  %v1494_v47 = vpop.f32.mrb[50].mxu1 }
 0x2cf   : > { %v1495_v48 = vpop.f32.mrb[51].mxu1 }
 0x2d0   : > { %1207 = vst [vmem:[%s2265_s5 + $0xb8] sm:$0xff] %v1175_v45  ;;  %v1056_v49 = vadd.f32 %v1493_v46, %v2254_v23  ;;  %v1496_v50 = vadd.f32 %v1495_v48, %v1494_v47 }
 0x2d2   : > { %v1144_v52 = vmul.f32 %v2256_v2, %v1056_v49  ;;  %v1059_v53 = vadd.f32 %v1496_v50, %v2254_v23 }
 0x2d4   : > { %v1176_v55 = vmax.f32 %v1110_v51, %v1144_v52  ;;  %v1145_v56 = vmul.f32 %v2256_v2, %v1059_v53  ;;  %v1497_v57 = vpop.f32.mrb[52].mxu1 }
 0x2d5   : > { %v1498_v58 = vpop.f32.mrb[53].mxu1 }
 0x2d6   : > { %1208 = vst [vmem:[%s2265_s5 + $0xc0] sm:$0xff] %v1176_v55  ;;  %v1177_v59 = vmax.f32 %v1111_v54, %v1145_v56  ;;  %v1499_v60 = vadd.f32 %v1498_v58, %v1497_v57  ;;  %v1500_v61 = vpop.f32.mrb[54].mxu1 }
 0x2d7   : > { %v1501_v62 = vpop.f32.mrb[55].mxu1 }
 0x2d8   : > { %1209 = vst [vmem:[%s2265_s5 + $0xc8] sm:$0xff] %v1177_v59  ;;  %v1064_v63 = vadd.f32 %v1499_v60, %v2254_v23  ;;  %v1502_v24 = vadd.f32 %v1501_v62, %v1500_v61 }
 0x2da   : > { %v1146_v3 = vmul.f32 %v2256_v2, %v1064_v63  ;;  %v1067_v4 = vadd.f32 %v1502_v24, %v2254_v23 }
 0x2dc   : > { %v1178_v6 = vmax.f32 %v1112_v1, %v1146_v3  ;;  %v1147_v7 = vmul.f32 %v2256_v2, %v1067_v4  ;;  %v1503_v8 = vpop.f32.mrb[56].mxu1 }
 0x2dd   : > { %v1504_v9 = vpop.f32.mrb[57].mxu1 }
 0x2de   : > { %1210 = vst [vmem:[%s2265_s5 + $0xd0] sm:$0xff] %v1178_v6  ;;  %v1179_v10 = vmax.f32 %v1113_v5, %v1147_v7  ;;  %v1505_v11 = vadd.f32 %v1504_v9, %v1503_v8  ;;  %v1506_v12 = vpop.f32.mrb[58].mxu1 }
 0x2df   : > { %v1507_v13 = vpop.f32.mrb[59].mxu1 }
 0x2e0   : > { %1211 = vst [vmem:[%s2265_s5 + $0xd8] sm:$0xff] %v1179_v10  ;;  %v1072_v14 = vadd.f32 %v1505_v11, %v2254_v23  ;;  %v1508_v15 = vadd.f32 %v1507_v13, %v1506_v12 }
 0x2e2   : > { %v1148_v17 = vmul.f32 %v2256_v2, %v1072_v14  ;;  %v1075_v18 = vadd.f32 %v1508_v15, %v2254_v23 }
 0x2e4   : > { %v1180_v20 = vmax.f32 %v1114_v16, %v1148_v17  ;;  %v1149_v21 = vmul.f32 %v2256_v2, %v1075_v18  ;;  %v1509_v22 = vpop.f32.mrb[60].mxu1 }
 0x2e5   : > { %v1510_v25 = vpop.f32.mrb[61].mxu1 }
 0x2e6   : > { %1212 = vst [vmem:[%s2265_s5 + $0xe0] sm:$0xff] %v1180_v20  ;;  %v1181_v26 = vmax.f32 %v1115_v19, %v1149_v21  ;;  %v1511_v0 = vadd.f32 %v1510_v25, %v1509_v22  ;;  %v1512_v27 = vpop.f32.mrb[62].mxu1 }
 0x2e7   : > { %v1513_v28 = vpop.f32.mrb[63].mxu1 }
 0x2e8   : > { %1213 = vst [vmem:[%s2265_s5 + $0xe8] sm:$0xff] %v1181_v26  ;;  %v1080_v29 = vadd.f32 %v1511_v0, %v2254_v23  ;;  %v1514_v30 = vadd.f32 %v1513_v28, %v1512_v27 }
 0x2ea   : > { %v1150_v32 = vmul.f32 %v2256_v2, %v1080_v29  ;;  %v1083_v33 = vadd.f32 %v1514_v30, %v2254_v23 }
 0x2ec   : > { %v1182_v35 = vmax.f32 %v1116_v31, %v1150_v32  ;;  %v1151_v36 = vmul.f32 %v2256_v2, %v1083_v33 }
 0x2ee   : > { %1214 = vst [vmem:[%s2265_s5 + $0xf0] sm:$0xff] %v1182_v35  ;;  %v1183_v37 = vmax.f32 %v1117_v34, %v1151_v36 }
 0x2f0   : > { %1215 = vst [vmem:[%s2265_s5 + $0xf8] sm:$0xff] %v1183_v37 }
 0x2f1   : > { %1763 = shalt.err (!%p1760_p5)
}
 0x2f2   : > { %s1764_s24 = scalar_lea.hbm %s2392_s1, 4096  ;;  %s1768_s12 = scalar_lea.hbm %s2447_s7, 8192 }
 0x2f3   : > { %p1765_p9 = scmp.ne.s32.totalorder %s2392_s1, %s1764_s24  ;;  %p1769_p11 = scmp.lt.u32.totalorder %s2392_s1, %s2447_s7 }
 0x2f4   : > { %p1770_p2 = scmp.lt.u32.totalorder %s1768_s12, %s1764_s24  ;;  %p1772_p1 = scmp.lt.u32.totalorder %s1764_s24, %s2392_s1 }
 0x2f5   : > { %p1766_p0 = pnand %p1765_p9, %p2475_p13 }
 0x2f6   : > { %p1771_p12 = por %p1770_p2, %p1769_p11 }
 0x2f7   : > { %p1767_p8 = pneg %p1766_p0 }
 0x2f8   : > { %p1773_p6 = por %p1772_p1, %p1771_p12 }
 0x2fa   : > { %p1774_p10 = pnand %p1773_p6, %p1767_p8 }
 0x2fc   : > { %1777 = shalt.err (!%p1774_p10)
}
 0x2fd   : > { %s1840_s3 = smov 128   ;;  %s1841_s5 = smov 8  }
 0x2fe   : > { %1527 = dma.vmem_to_hbm [thread:$0]  (%p2475_p13), %s2394_s25, 4096, %s2392_s1, %s1217_s15, %s1840_s3, %s1840_s3, %s1841_s5  }
 0x2ff PF: > { %s1245_s20 = sand.u32 1, %s1816_s26   ;;  %p2476_p4 = scmp.ne.s32.totalorder %s2459_s9, 0 }
 0x300   : > { %p2477_p7 = scmp.ge.s32.totalorder %s1828_s29, 2  ;;  %s1246_s22 = scalar_lea.sflag [#allocation6], %s1245_s20 }
 0x302   : > { %p1544_p3 = pnand %p2477_p7, %p2476_p4 }
 0x304   : > { %1811 = dma.done.wait (!%p1544_p3), %s1246_s22, 4096  }
 0x305   : > { %1813 = vsyncadd (!%p1544_p3), %s1246_s22, 4294963200  ;;  %p25_p5 = scmp.ge.s32.totalorder %s1998_s14, 4   ;;  %s2478_s26 = smov %s1820_s27 }
 0x306   : > { %s2479_s27 = smov %s1824_s28  ;;  %s2480_s28 = smov %s2007_s18 }
 0x307   : > { %s2481_s29 = smov %s1998_s14  ;;  %27 = sbr.rel (!%p25_p5) target bundleno = 13 (0xd), region = 110 }
 0x30e   :  { %1251 = vsyncpa [#allocation5], 1 }
 0x30f   :  { %1253 = vsyncpa [#allocation5 + $0x1], 1 }
 0x310   :  { %1254 = vsyncpa [#allocation8], 1 }
 0x311   :  { %1256 = vsyncpa [#allocation8 + $0x1], 1 }
 0x312   :  { %1257 = vsyncpa [#allocation11], 1 }
 0x313   :  { %1258 = vsyncpa [#allocation6], 1 }
 0x314   :  { %1260 = vsyncpa [#allocation6 + $0x1], 1 }

</bundles_post_ra>
